<compile_context>
chip_gen: v7x
topology: tpu7x:2x2x1
jax: 0.10.0
libtpu: 0.0.40
codegen_flags: <defaults>
</compile_context>

<pallas_src>
import jax
import jax.numpy as jnp
from jax.experimental import pallas as pl
from jax.experimental.pallas import tpu as pltpu

IN_FEATURE = 2
HIDDEN = 40
NUM_CLASSES = 2
LAYERS = 10
BN_EPS = 1e-5

TN = 512          # batch tile (lane dimension inside the kernel); multiple of 128
HALF = TN // 2    # two interleaved sub-tiles per grid step


def _mlp_kernel(x_ref, w1_ref, c1_ref, wh_ref, ch_ref, wd_ref, bd_ref, o_ref):
    # Feature-major: lane axis = batch tile.
    # x_ref:  (IN, TN)          w1_ref: (H, IN)  [BN scale pre-folded]   c1_ref: (H, 1)
    # wh_ref: (L-2, H, H) [BN scale pre-folded]  ch_ref: (L-2, H, 1)
    # wd_ref: (1, H)  bd_ref: (1, 1)             o_ref: (C, TN)
    w1 = w1_ref[...]                               # (H, 2)
    c1 = c1_ref[...]                               # (H, 1)

    xa = x_ref[:, 0:HALF]                          # (2, HALF)
    xb = x_ref[:, HALF:TN]                         # (2, HALF)

    # First layer: contraction dim of only 2 -> VPU broadcast-MAC, not MXU.
    ha = jnp.maximum(w1[:, 0:1] * xa[0:1, :] + w1[:, 1:2] * xa[1:2, :] + c1, 0.0)
    hb = jnp.maximum(w1[:, 0:1] * xb[0:1, :] + w1[:, 1:2] * xb[1:2, :] + c1, 0.0)

    # Hidden chain: short static trip count -> unroll in Python.  The two sub-tiles are
    # independent, so their matmuls per layer interleave in the MXU (hide fill/drain).
    for l in range(LAYERS - 2):
        wl = wh_ref[l]                             # (H, H)
        cl = ch_ref[l]                             # (H, 1)
        za = jnp.dot(wl, ha, preferred_element_type=jnp.float32)   # (H, HALF)
        zb = jnp.dot(wl, hb, preferred_element_type=jnp.float32)   # (H, HALF)
        ha = jnp.maximum(za + cl, 0.0)
        hb = jnp.maximum(zb + cl, 0.0)

    # Classifier reduced to the logit difference d = l1 - l0.
    wd = wd_ref[...]                               # (1, H)
    bd = bd_ref[...]                               # (1, 1)
    da = jnp.dot(wd, ha, preferred_element_type=jnp.float32) + bd  # (1, HALF)
    db = jnp.dot(wd, hb, preferred_element_type=jnp.float32) + bd  # (1, HALF)

    # Closed-form 2-class log_softmax: out0 = -softplus(d), out1 = d - softplus(d).
    spa = jnp.maximum(da, 0.0) + jnp.log1p(jnp.exp(-jnp.abs(da)))  # stable softplus
    spb = jnp.maximum(db, 0.0) + jnp.log1p(jnp.exp(-jnp.abs(db)))

    # Direct lane-dense row stores; no sublane concatenate.
    o_ref[0:1, 0:HALF] = -spa
    o_ref[1:2, 0:HALF] = da - spa
    o_ref[0:1, HALF:TN] = -spb
    o_ref[1:2, HALF:TN] = db - spb


def prepare_params(params):
    """One-time parameter prep: fold eval-mode BN (+ linear bias) into the weights / a
    per-feature shift, and reduce the classifier to the single logit-difference row."""
    (w1, b1, g1, be1, rm1, rv1,
     wh, bh, gh, beh, rmh, rvh,
     wc, bc) = params

    s1 = g1 / jnp.sqrt(rv1 + BN_EPS)                       # (H,)
    c1 = be1 + s1 * (b1 - rm1)                             # (H,)
    w1f = s1[:, None] * w1                                 # (H, IN)  scale folded into weights

    sh = gh / jnp.sqrt(rvh + BN_EPS)                       # (L-2, H)
    ch = beh + sh * (bh - rmh)                             # (L-2, H)
    whf = sh[:, :, None] * wh                              # (L-2, H, H)

    wd = (wc[1] - wc[0]).reshape(1, HIDDEN)                # classifier -> logit difference row
    bd = (bc[1] - bc[0]).reshape(1, 1)

    return (
        w1f,
        c1.reshape(HIDDEN, 1),
        whf,
        ch.reshape(LAYERS - 2, HIDDEN, 1),
        wd,
        bd,
    )


@jax.jit
def linear_mlp_forward(x, kparams):
    """x: (N, IN_FEATURE) float32 -> (N, NUM_CLASSES) log-probabilities."""
    w1f, c1, whf, ch, wd, bd = kparams

    n = x.shape[0]
    n_pad = pl.cdiv(n, TN) * TN
    # Feature-major input for the kernel: (IN, n_pad), zero-padded batch columns.
    # (Pad/transposes are negligible at this N; for huge N keep adjacent ops feature-major.)
    xt = jnp.pad(x.astype(jnp.float32).T, ((0, 0), (0, n_pad - n)))

    const2 = lambda i: (0, 0)
    const3 = lambda i: (0, 0, 0)

    flops = n_pad * (2 * HIDDEN * IN_FEATURE
                     + 2 * HIDDEN * HIDDEN * (LAYERS - 2)
                     + 2 * HIDDEN + 8)
    bytes_accessed = 4 * (IN_FEATURE * n_pad + NUM_CLASSES * n_pad
                          + HIDDEN * IN_FEATURE + HIDDEN
                          + (LAYERS - 2) * HIDDEN * (HIDDEN + 1)
                          + HIDDEN + 1)
    cost = pl.CostEstimate(flops=int(flops),
                           transcendentals=int(2 * n_pad),
                           bytes_accessed=int(bytes_accessed))

    out_t = pl.pallas_call(
        _mlp_kernel,
        out_shape=jax.ShapeDtypeStruct((NUM_CLASSES, n_pad), jnp.float32),
        grid_spec=pltpu.PrefetchScalarGridSpec(
            num_scalar_prefetch=0,
            grid=(n_pad // TN,),
            in_specs=[
                pl.BlockSpec((IN_FEATURE, TN), lambda i: (0, i)),          # x tile
                pl.BlockSpec((HIDDEN, IN_FEATURE), const2),                # w1f (resident)
                pl.BlockSpec((HIDDEN, 1), const2),                         # c1
                pl.BlockSpec((LAYERS - 2, HIDDEN, HIDDEN), const3),        # whf (resident)
                pl.BlockSpec((LAYERS - 2, HIDDEN, 1), const3),             # ch
                pl.BlockSpec((1, HIDDEN), const2),                         # wd
                pl.BlockSpec((1, 1), const2),                              # bd
            ],
            out_specs=pl.BlockSpec((NUM_CLASSES, TN), lambda i: (0, i)),
        ),
        compiler_params=pltpu.CompilerParams(
            dimension_semantics=("parallel",),   # independent batch tiles (v7x 2-TC sharding)
        ),
        cost_estimate=cost,
    )(xt, w1f, c1, whf, ch, wd, bd)

    return out_t[:, :n].T                         # back to (N, C)


def init_params(key):
    ks = jax.random.split(key, 8)
    w1 = jax.random.normal(ks[0], (HIDDEN, IN_FEATURE), jnp.float32) * 0.3
    b1 = jax.random.normal(ks[1], (HIDDEN,), jnp.float32) * 0.1
    g1 = 1.0 + 0.05 * jax.random.normal(ks[2], (HIDDEN,), jnp.float32)
    be1 = 0.05 * jax.random.normal(ks[3], (HIDDEN,), jnp.float32)
    rm1 = 0.01 * jax.random.normal(ks[4], (HIDDEN,), jnp.float32)
    rv1 = jnp.ones((HIDDEN,), jnp.float32)

    kh = jax.random.split(ks[5], 6)
    nh = LAYERS - 2
    wh = jax.random.normal(kh[0], (nh, HIDDEN, HIDDEN), jnp.float32) * 0.15
    bh = jax.random.normal(kh[1], (nh, HIDDEN), jnp.float32) * 0.1
    gh = 1.0 + 0.05 * jax.random.normal(kh[2], (nh, HIDDEN), jnp.float32)
    beh = 0.05 * jax.random.normal(kh[3], (nh, HIDDEN), jnp.float32)
    rmh = 0.01 * jax.random.normal(kh[4], (nh, HIDDEN), jnp.float32)
    rvh = jnp.ones((nh, HIDDEN), jnp.float32)

    wc = jax.random.normal(ks[6], (NUM_CLASSES, HIDDEN), jnp.float32) * 0.2
    bc = jax.random.normal(ks[7], (NUM_CLASSES,), jnp.float32) * 0.1
    return (w1, b1, g1, be1, rm1, rv1, wh, bh, gh, beh, rmh, rvh, wc, bc)


def reference_forward(x, params):
    (w1, b1, g1, be1, rm1, rv1, wh, bh, gh, beh, rmh, rvh, wc, bc) = params
    h = x @ w1.T + b1
    h = jax.nn.relu(g1 * (h - rm1) / jnp.sqrt(rv1 + BN_EPS) + be1)
    for l in range(LAYERS - 2):
        h = h @ wh[l].T + bh[l]
        h = jax.nn.relu(gh[l] * (h - rmh[l]) / jnp.sqrt(rvh[l] + BN_EPS) + beh[l])
    logits = h @ wc.T + bc
    return jax.nn.log_softmax(logits, axis=1)


if __name__ == "__main__":
    key = jax.random.PRNGKey(0)
    kx, kp = jax.random.split(key)
    N = 1000                                   # exercises 2 grid steps (even, for v7x) + padding
    x = jax.random.normal(kx, (N, IN_FEATURE), jnp.float32)
    params = init_params(kp)

    kparams = prepare_params(params)           # one-time BN folding / layout prep

    out = linear_mlp_forward(x, kparams)
    out = jax.block_until_ready(out)

    ref = reference_forward(x, params)
    assert out.shape == (N, NUM_CLASSES)
    assert jnp.allclose(out, ref, atol=3e-5, rtol=3e-5), "mismatch vs JAX reference"

    print("KERNEL_OK")
</pallas_src>

<mosaic_0001>
module attributes {stable_mosaic.version = 11 : i64} {
  func.func @_mlp_kernel(%arg0: i32, %arg1: memref<2x512xf32, #tpu.memory_space<vmem>>, %arg2: memref<40x2xf32, #tpu.memory_space<vmem>>, %arg3: memref<40x1xf32, #tpu.memory_space<vmem>>, %arg4: memref<8x40x40xf32, #tpu.memory_space<vmem>>, %arg5: memref<8x40x1xf32, #tpu.memory_space<vmem>>, %arg6: memref<1x40xf32, #tpu.memory_space<vmem>>, %arg7: memref<1x1xf32, #tpu.memory_space<vmem>>, %arg8: memref<2x512xf32, #tpu.memory_space<vmem>>) attributes {dimension_semantics = [#tpu.dimension_semantics<parallel>], iteration_bounds = array<i64: 2>, scalar_prefetch = 0 : i64, scratch_operands = 0 : i64, tpu.core_type = #tpu.core_type<tc>, window_params = [{transform_indices = @transform_0, window_bounds = array<i64: 2, 512>}, {pipeline_mode = #tpu.pipeline_mode<synchronous>, transform_indices = @transform_1, window_bounds = array<i64: 40, 2>}, {pipeline_mode = #tpu.pipeline_mode<synchronous>, transform_indices = @transform_2, window_bounds = array<i64: 40, 1>}, {pipeline_mode = #tpu.pipeline_mode<synchronous>, transform_indices = @transform_3, window_bounds = array<i64: 8, 40, 40>}, {pipeline_mode = #tpu.pipeline_mode<synchronous>, transform_indices = @transform_4, window_bounds = array<i64: 8, 40, 1>}, {pipeline_mode = #tpu.pipeline_mode<synchronous>, transform_indices = @transform_5, window_bounds = array<i64: 1, 40>}, {pipeline_mode = #tpu.pipeline_mode<synchronous>, transform_indices = @transform_6, window_bounds = array<i64: 1, 1>}, {transform_indices = @transform_7, window_bounds = array<i64: 2, 512>}]} {
    %c0 = arith.constant 0 : index
    %c0_0 = arith.constant 0 : index
    %0 = vector.load %arg2[%c0, %c0_0] : memref<40x2xf32, #tpu.memory_space<vmem>>, vector<40x2xf32>
    %c0_1 = arith.constant 0 : index
    %c0_2 = arith.constant 0 : index
    %1 = vector.load %arg3[%c0_1, %c0_2] : memref<40x1xf32, #tpu.memory_space<vmem>>, vector<40x1xf32>
    %c0_3 = arith.constant 0 : index
    %c0_4 = arith.constant 0 : index
    %2 = vector.load %arg1[%c0_3, %c0_4] : memref<2x512xf32, #tpu.memory_space<vmem>>, vector<2x256xf32>
    %c0_5 = arith.constant 0 : index
    %c256 = arith.constant 256 : index
    %3 = vector.load %arg1[%c0_5, %c256] : memref<2x512xf32, #tpu.memory_space<vmem>>, vector<2x256xf32>
    %4 = vector.extract_strided_slice %0 {offsets = [0, 0], sizes = [40, 1], strides = [1, 1]} : vector<40x2xf32> to vector<40x1xf32>
    %5 = vector.extract_strided_slice %2 {offsets = [0, 0], sizes = [1, 256], strides = [1, 1]} : vector<2x256xf32> to vector<1x256xf32>
    %6 = vector.broadcast %4 : vector<40x1xf32> to vector<40x256xf32>
    %7 = vector.broadcast %5 : vector<1x256xf32> to vector<40x256xf32>
    %8 = arith.mulf %6, %7 : vector<40x256xf32>
    %9 = vector.extract_strided_slice %0 {offsets = [0, 1], sizes = [40, 1], strides = [1, 1]} : vector<40x2xf32> to vector<40x1xf32>
    %10 = vector.extract_strided_slice %2 {offsets = [1, 0], sizes = [1, 256], strides = [1, 1]} : vector<2x256xf32> to vector<1x256xf32>
    %11 = vector.broadcast %9 : vector<40x1xf32> to vector<40x256xf32>
    %12 = vector.broadcast %10 : vector<1x256xf32> to vector<40x256xf32>
    %13 = arith.mulf %11, %12 : vector<40x256xf32>
    %14 = arith.addf %8, %13 : vector<40x256xf32>
    %15 = vector.broadcast %1 : vector<40x1xf32> to vector<40x256xf32>
    %16 = arith.addf %14, %15 : vector<40x256xf32>
    %cst = arith.constant 0.000000e+00 : f32
    %17 = vector.broadcast %cst : f32 to vector<40x256xf32>
    %18 = arith.maximumf %16, %17 : vector<40x256xf32>
    %19 = vector.extract_strided_slice %0 {offsets = [0, 0], sizes = [40, 1], strides = [1, 1]} : vector<40x2xf32> to vector<40x1xf32>
    %20 = vector.extract_strided_slice %3 {offsets = [0, 0], sizes = [1, 256], strides = [1, 1]} : vector<2x256xf32> to vector<1x256xf32>
    %21 = vector.broadcast %19 : vector<40x1xf32> to vector<40x256xf32>
    %22 = vector.broadcast %20 : vector<1x256xf32> to vector<40x256xf32>
    %23 = arith.mulf %21, %22 : vector<40x256xf32>
    %24 = vector.extract_strided_slice %0 {offsets = [0, 1], sizes = [40, 1], strides = [1, 1]} : vector<40x2xf32> to vector<40x1xf32>
    %25 = vector.extract_strided_slice %3 {offsets = [1, 0], sizes = [1, 256], strides = [1, 1]} : vector<2x256xf32> to vector<1x256xf32>
    %26 = vector.broadcast %24 : vector<40x1xf32> to vector<40x256xf32>
    %27 = vector.broadcast %25 : vector<1x256xf32> to vector<40x256xf32>
    %28 = arith.mulf %26, %27 : vector<40x256xf32>
    %29 = arith.addf %23, %28 : vector<40x256xf32>
    %30 = vector.broadcast %1 : vector<40x1xf32> to vector<40x256xf32>
    %31 = arith.addf %29, %30 : vector<40x256xf32>
    %cst_6 = arith.constant 0.000000e+00 : f32
    %32 = vector.broadcast %cst_6 : f32 to vector<40x256xf32>
    %33 = arith.maximumf %31, %32 : vector<40x256xf32>
    %c0_7 = arith.constant 0 : index
    %c0_8 = arith.constant 0 : index
    %c0_9 = arith.constant 0 : index
    %34 = vector.load %arg4[%c0_7, %c0_8, %c0_9] : memref<8x40x40xf32, #tpu.memory_space<vmem>>, vector<1x40x40xf32>
    %35 = vector.shape_cast %34 : vector<1x40x40xf32> to vector<40x40xf32>
    %c0_10 = arith.constant 0 : index
    %c0_11 = arith.constant 0 : index
    %c0_12 = arith.constant 0 : index
    %36 = vector.load %arg5[%c0_10, %c0_11, %c0_12] : memref<8x40x1xf32, #tpu.memory_space<vmem>>, vector<1x40x1xf32>
    %37 = vector.shape_cast %36 : vector<1x40x1xf32> to vector<40x1xf32>
    %cst_13 = arith.constant dense<0.000000e+00> : vector<40x256xf32>
    %38 = tpu.matmul %35, %18, %cst_13 {dimension_numbers = #tpu.dot_dimension_numbers<[1], [0], [0], [1], [0, 0, 1, 1], [], []>} : vector<40x40xf32>, vector<40x256xf32>, vector<40x256xf32> -> vector<40x256xf32>
    %cst_14 = arith.constant dense<0.000000e+00> : vector<40x256xf32>
    %39 = tpu.matmul %35, %33, %cst_14 {dimension_numbers = #tpu.dot_dimension_numbers<[1], [0], [0], [1], [0, 0, 1, 1], [], []>} : vector<40x40xf32>, vector<40x256xf32>, vector<40x256xf32> -> vector<40x256xf32>
    %40 = vector.broadcast %37 : vector<40x1xf32> to vector<40x256xf32>
    %41 = arith.addf %38, %40 : vector<40x256xf32>
    %cst_15 = arith.constant 0.000000e+00 : f32
    %42 = vector.broadcast %cst_15 : f32 to vector<40x256xf32>
    %43 = arith.maximumf %41, %42 : vector<40x256xf32>
    %44 = vector.broadcast %37 : vector<40x1xf32> to vector<40x256xf32>
    %45 = arith.addf %39, %44 : vector<40x256xf32>
    %cst_16 = arith.constant 0.000000e+00 : f32
    %46 = vector.broadcast %cst_16 : f32 to vector<40x256xf32>
    %47 = arith.maximumf %45, %46 : vector<40x256xf32>
    %c1 = arith.constant 1 : index
    %c0_17 = arith.constant 0 : index
    %c0_18 = arith.constant 0 : index
    %48 = vector.load %arg4[%c1, %c0_17, %c0_18] : memref<8x40x40xf32, #tpu.memory_space<vmem>>, vector<1x40x40xf32>
    %49 = vector.shape_cast %48 : vector<1x40x40xf32> to vector<40x40xf32>
    %c1_19 = arith.constant 1 : index
    %c0_20 = arith.constant 0 : index
    %c0_21 = arith.constant 0 : index
    %50 = vector.load %arg5[%c1_19, %c0_20, %c0_21] : memref<8x40x1xf32, #tpu.memory_space<vmem>>, vector<1x40x1xf32>
    %51 = vector.shape_cast %50 : vector<1x40x1xf32> to vector<40x1xf32>
    %cst_22 = arith.constant dense<0.000000e+00> : vector<40x256xf32>
    %52 = tpu.matmul %49, %43, %cst_22 {dimension_numbers = #tpu.dot_dimension_numbers<[1], [0], [0], [1], [0, 0, 1, 1], [], []>} : vector<40x40xf32>, vector<40x256xf32>, vector<40x256xf32> -> vector<40x256xf32>
    %cst_23 = arith.constant dense<0.000000e+00> : vector<40x256xf32>
    %53 = tpu.matmul %49, %47, %cst_23 {dimension_numbers = #tpu.dot_dimension_numbers<[1], [0], [0], [1], [0, 0, 1, 1], [], []>} : vector<40x40xf32>, vector<40x256xf32>, vector<40x256xf32> -> vector<40x256xf32>
    %54 = vector.broadcast %51 : vector<40x1xf32> to vector<40x256xf32>
    %55 = arith.addf %52, %54 : vector<40x256xf32>
    %cst_24 = arith.constant 0.000000e+00 : f32
    %56 = vector.broadcast %cst_24 : f32 to vector<40x256xf32>
    %57 = arith.maximumf %55, %56 : vector<40x256xf32>
    %58 = vector.broadcast %51 : vector<40x1xf32> to vector<40x256xf32>
    %59 = arith.addf %53, %58 : vector<40x256xf32>
    %cst_25 = arith.constant 0.000000e+00 : f32
    %60 = vector.broadcast %cst_25 : f32 to vector<40x256xf32>
    %61 = arith.maximumf %59, %60 : vector<40x256xf32>
    %c2 = arith.constant 2 : index
    %c0_26 = arith.constant 0 : index
    %c0_27 = arith.constant 0 : index
    %62 = vector.load %arg4[%c2, %c0_26, %c0_27] : memref<8x40x40xf32, #tpu.memory_space<vmem>>, vector<1x40x40xf32>
    %63 = vector.shape_cast %62 : vector<1x40x40xf32> to vector<40x40xf32>
    %c2_28 = arith.constant 2 : index
    %c0_29 = arith.constant 0 : index
    %c0_30 = arith.constant 0 : index
    %64 = vector.load %arg5[%c2_28, %c0_29, %c0_30] : memref<8x40x1xf32, #tpu.memory_space<vmem>>, vector<1x40x1xf32>
    %65 = vector.shape_cast %64 : vector<1x40x1xf32> to vector<40x1xf32>
    %cst_31 = arith.constant dense<0.000000e+00> : vector<40x256xf32>
    %66 = tpu.matmul %63, %57, %cst_31 {dimension_numbers = #tpu.dot_dimension_numbers<[1], [0], [0], [1], [0, 0, 1, 1], [], []>} : vector<40x40xf32>, vector<40x256xf32>, vector<40x256xf32> -> vector<40x256xf32>
    %cst_32 = arith.constant dense<0.000000e+00> : vector<40x256xf32>
    %67 = tpu.matmul %63, %61, %cst_32 {dimension_numbers = #tpu.dot_dimension_numbers<[1], [0], [0], [1], [0, 0, 1, 1], [], []>} : vector<40x40xf32>, vector<40x256xf32>, vector<40x256xf32> -> vector<40x256xf32>
    %68 = vector.broadcast %65 : vector<40x1xf32> to vector<40x256xf32>
    %69 = arith.addf %66, %68 : vector<40x256xf32>
    %cst_33 = arith.constant 0.000000e+00 : f32
    %70 = vector.broadcast %cst_33 : f32 to vector<40x256xf32>
    %71 = arith.maximumf %69, %70 : vector<40x256xf32>
    %72 = vector.broadcast %65 : vector<40x1xf32> to vector<40x256xf32>
    %73 = arith.addf %67, %72 : vector<40x256xf32>
    %cst_34 = arith.constant 0.000000e+00 : f32
    %74 = vector.broadcast %cst_34 : f32 to vector<40x256xf32>
    %75 = arith.maximumf %73, %74 : vector<40x256xf32>
    %c3 = arith.constant 3 : index
    %c0_35 = arith.constant 0 : index
    %c0_36 = arith.constant 0 : index
    %76 = vector.load %arg4[%c3, %c0_35, %c0_36] : memref<8x40x40xf32, #tpu.memory_space<vmem>>, vector<1x40x40xf32>
    %77 = vector.shape_cast %76 : vector<1x40x40xf32> to vector<40x40xf32>
    %c3_37 = arith.constant 3 : index
    %c0_38 = arith.constant 0 : index
    %c0_39 = arith.constant 0 : index
    %78 = vector.load %arg5[%c3_37, %c0_38, %c0_39] : memref<8x40x1xf32, #tpu.memory_space<vmem>>, vector<1x40x1xf32>
    %79 = vector.shape_cast %78 : vector<1x40x1xf32> to vector<40x1xf32>
    %cst_40 = arith.constant dense<0.000000e+00> : vector<40x256xf32>
    %80 = tpu.matmul %77, %71, %cst_40 {dimension_numbers = #tpu.dot_dimension_numbers<[1], [0], [0], [1], [0, 0, 1, 1], [], []>} : vector<40x40xf32>, vector<40x256xf32>, vector<40x256xf32> -> vector<40x256xf32>
    %cst_41 = arith.constant dense<0.000000e+00> : vector<40x256xf32>
    %81 = tpu.matmul %77, %75, %cst_41 {dimension_numbers = #tpu.dot_dimension_numbers<[1], [0], [0], [1], [0, 0, 1, 1], [], []>} : vector<40x40xf32>, vector<40x256xf32>, vector<40x256xf32> -> vector<40x256xf32>
    %82 = vector.broadcast %79 : vector<40x1xf32> to vector<40x256xf32>
    %83 = arith.addf %80, %82 : vector<40x256xf32>
    %cst_42 = arith.constant 0.000000e+00 : f32
    %84 = vector.broadcast %cst_42 : f32 to vector<40x256xf32>
    %85 = arith.maximumf %83, %84 : vector<40x256xf32>
    %86 = vector.broadcast %79 : vector<40x1xf32> to vector<40x256xf32>
    %87 = arith.addf %81, %86 : vector<40x256xf32>
    %cst_43 = arith.constant 0.000000e+00 : f32
    %88 = vector.broadcast %cst_43 : f32 to vector<40x256xf32>
    %89 = arith.maximumf %87, %88 : vector<40x256xf32>
    %c4 = arith.constant 4 : index
    %c0_44 = arith.constant 0 : index
    %c0_45 = arith.constant 0 : index
    %90 = vector.load %arg4[%c4, %c0_44, %c0_45] : memref<8x40x40xf32, #tpu.memory_space<vmem>>, vector<1x40x40xf32>
    %91 = vector.shape_cast %90 : vector<1x40x40xf32> to vector<40x40xf32>
    %c4_46 = arith.constant 4 : index
    %c0_47 = arith.constant 0 : index
    %c0_48 = arith.constant 0 : index
    %92 = vector.load %arg5[%c4_46, %c0_47, %c0_48] : memref<8x40x1xf32, #tpu.memory_space<vmem>>, vector<1x40x1xf32>
    %93 = vector.shape_cast %92 : vector<1x40x1xf32> to vector<40x1xf32>
    %cst_49 = arith.constant dense<0.000000e+00> : vector<40x256xf32>
    %94 = tpu.matmul %91, %85, %cst_49 {dimension_numbers = #tpu.dot_dimension_numbers<[1], [0], [0], [1], [0, 0, 1, 1], [], []>} : vector<40x40xf32>, vector<40x256xf32>, vector<40x256xf32> -> vector<40x256xf32>
    %cst_50 = arith.constant dense<0.000000e+00> : vector<40x256xf32>
    %95 = tpu.matmul %91, %89, %cst_50 {dimension_numbers = #tpu.dot_dimension_numbers<[1], [0], [0], [1], [0, 0, 1, 1], [], []>} : vector<40x40xf32>, vector<40x256xf32>, vector<40x256xf32> -> vector<40x256xf32>
    %96 = vector.broadcast %93 : vector<40x1xf32> to vector<40x256xf32>
    %97 = arith.addf %94, %96 : vector<40x256xf32>
    %cst_51 = arith.constant 0.000000e+00 : f32
    %98 = vector.broadcast %cst_51 : f32 to vector<40x256xf32>
    %99 = arith.maximumf %97, %98 : vector<40x256xf32>
    %100 = vector.broadcast %93 : vector<40x1xf32> to vector<40x256xf32>
    %101 = arith.addf %95, %100 : vector<40x256xf32>
    %cst_52 = arith.constant 0.000000e+00 : f32
    %102 = vector.broadcast %cst_52 : f32 to vector<40x256xf32>
    %103 = arith.maximumf %101, %102 : vector<40x256xf32>
    %c5 = arith.constant 5 : index
    %c0_53 = arith.constant 0 : index
    %c0_54 = arith.constant 0 : index
    %104 = vector.load %arg4[%c5, %c0_53, %c0_54] : memref<8x40x40xf32, #tpu.memory_space<vmem>>, vector<1x40x40xf32>
    %105 = vector.shape_cast %104 : vector<1x40x40xf32> to vector<40x40xf32>
    %c5_55 = arith.constant 5 : index
    %c0_56 = arith.constant 0 : index
    %c0_57 = arith.constant 0 : index
    %106 = vector.load %arg5[%c5_55, %c0_56, %c0_57] : memref<8x40x1xf32, #tpu.memory_space<vmem>>, vector<1x40x1xf32>
    %107 = vector.shape_cast %106 : vector<1x40x1xf32> to vector<40x1xf32>
    %cst_58 = arith.constant dense<0.000000e+00> : vector<40x256xf32>
    %108 = tpu.matmul %105, %99, %cst_58 {dimension_numbers = #tpu.dot_dimension_numbers<[1], [0], [0], [1], [0, 0, 1, 1], [], []>} : vector<40x40xf32>, vector<40x256xf32>, vector<40x256xf32> -> vector<40x256xf32>
    %cst_59 = arith.constant dense<0.000000e+00> : vector<40x256xf32>
    %109 = tpu.matmul %105, %103, %cst_59 {dimension_numbers = #tpu.dot_dimension_numbers<[1], [0], [0], [1], [0, 0, 1, 1], [], []>} : vector<40x40xf32>, vector<40x256xf32>, vector<40x256xf32> -> vector<40x256xf32>
    %110 = vector.broadcast %107 : vector<40x1xf32> to vector<40x256xf32>
    %111 = arith.addf %108, %110 : vector<40x256xf32>
    %cst_60 = arith.constant 0.000000e+00 : f32
    %112 = vector.broadcast %cst_60 : f32 to vector<40x256xf32>
    %113 = arith.maximumf %111, %112 : vector<40x256xf32>
    %114 = vector.broadcast %107 : vector<40x1xf32> to vector<40x256xf32>
    %115 = arith.addf %109, %114 : vector<40x256xf32>
    %cst_61 = arith.constant 0.000000e+00 : f32
    %116 = vector.broadcast %cst_61 : f32 to vector<40x256xf32>
    %117 = arith.maximumf %115, %116 : vector<40x256xf32>
    %c6 = arith.constant 6 : index
    %c0_62 = arith.constant 0 : index
    %c0_63 = arith.constant 0 : index
    %118 = vector.load %arg4[%c6, %c0_62, %c0_63] : memref<8x40x40xf32, #tpu.memory_space<vmem>>, vector<1x40x40xf32>
    %119 = vector.shape_cast %118 : vector<1x40x40xf32> to vector<40x40xf32>
    %c6_64 = arith.constant 6 : index
    %c0_65 = arith.constant 0 : index
    %c0_66 = arith.constant 0 : index
    %120 = vector.load %arg5[%c6_64, %c0_65, %c0_66] : memref<8x40x1xf32, #tpu.memory_space<vmem>>, vector<1x40x1xf32>
    %121 = vector.shape_cast %120 : vector<1x40x1xf32> to vector<40x1xf32>
    %cst_67 = arith.constant dense<0.000000e+00> : vector<40x256xf32>
    %122 = tpu.matmul %119, %113, %cst_67 {dimension_numbers = #tpu.dot_dimension_numbers<[1], [0], [0], [1], [0, 0, 1, 1], [], []>} : vector<40x40xf32>, vector<40x256xf32>, vector<40x256xf32> -> vector<40x256xf32>
    %cst_68 = arith.constant dense<0.000000e+00> : vector<40x256xf32>
    %123 = tpu.matmul %119, %117, %cst_68 {dimension_numbers = #tpu.dot_dimension_numbers<[1], [0], [0], [1], [0, 0, 1, 1], [], []>} : vector<40x40xf32>, vector<40x256xf32>, vector<40x256xf32> -> vector<40x256xf32>
    %124 = vector.broadcast %121 : vector<40x1xf32> to vector<40x256xf32>
    %125 = arith.addf %122, %124 : vector<40x256xf32>
    %cst_69 = arith.constant 0.000000e+00 : f32
    %126 = vector.broadcast %cst_69 : f32 to vector<40x256xf32>
    %127 = arith.maximumf %125, %126 : vector<40x256xf32>
    %128 = vector.broadcast %121 : vector<40x1xf32> to vector<40x256xf32>
    %129 = arith.addf %123, %128 : vector<40x256xf32>
    %cst_70 = arith.constant 0.000000e+00 : f32
    %130 = vector.broadcast %cst_70 : f32 to vector<40x256xf32>
    %131 = arith.maximumf %129, %130 : vector<40x256xf32>
    %c7 = arith.constant 7 : index
    %c0_71 = arith.constant 0 : index
    %c0_72 = arith.constant 0 : index
    %132 = vector.load %arg4[%c7, %c0_71, %c0_72] : memref<8x40x40xf32, #tpu.memory_space<vmem>>, vector<1x40x40xf32>
    %133 = vector.shape_cast %132 : vector<1x40x40xf32> to vector<40x40xf32>
    %c7_73 = arith.constant 7 : index
    %c0_74 = arith.constant 0 : index
    %c0_75 = arith.constant 0 : index
    %134 = vector.load %arg5[%c7_73, %c0_74, %c0_75] : memref<8x40x1xf32, #tpu.memory_space<vmem>>, vector<1x40x1xf32>
    %135 = vector.shape_cast %134 : vector<1x40x1xf32> to vector<40x1xf32>
    %cst_76 = arith.constant dense<0.000000e+00> : vector<40x256xf32>
    %136 = tpu.matmul %133, %127, %cst_76 {dimension_numbers = #tpu.dot_dimension_numbers<[1], [0], [0], [1], [0, 0, 1, 1], [], []>} : vector<40x40xf32>, vector<40x256xf32>, vector<40x256xf32> -> vector<40x256xf32>
    %cst_77 = arith.constant dense<0.000000e+00> : vector<40x256xf32>
    %137 = tpu.matmul %133, %131, %cst_77 {dimension_numbers = #tpu.dot_dimension_numbers<[1], [0], [0], [1], [0, 0, 1, 1], [], []>} : vector<40x40xf32>, vector<40x256xf32>, vector<40x256xf32> -> vector<40x256xf32>
    %138 = vector.broadcast %135 : vector<40x1xf32> to vector<40x256xf32>
    %139 = arith.addf %136, %138 : vector<40x256xf32>
    %cst_78 = arith.constant 0.000000e+00 : f32
    %140 = vector.broadcast %cst_78 : f32 to vector<40x256xf32>
    %141 = arith.maximumf %139, %140 : vector<40x256xf32>
    %142 = vector.broadcast %135 : vector<40x1xf32> to vector<40x256xf32>
    %143 = arith.addf %137, %142 : vector<40x256xf32>
    %cst_79 = arith.constant 0.000000e+00 : f32
    %144 = vector.broadcast %cst_79 : f32 to vector<40x256xf32>
    %145 = arith.maximumf %143, %144 : vector<40x256xf32>
    %c0_80 = arith.constant 0 : index
    %c0_81 = arith.constant 0 : index
    %146 = vector.load %arg6[%c0_80, %c0_81] : memref<1x40xf32, #tpu.memory_space<vmem>>, vector<1x40xf32>
    %c0_82 = arith.constant 0 : index
    %c0_83 = arith.constant 0 : index
    %147 = vector.load %arg7[%c0_82, %c0_83] : memref<1x1xf32, #tpu.memory_space<vmem>>, vector<1x1xf32>
    %cst_84 = arith.constant dense<0.000000e+00> : vector<1x256xf32>
    %148 = tpu.matmul %146, %141, %cst_84 {dimension_numbers = #tpu.dot_dimension_numbers<[1], [0], [0], [1], [0, 0, 1, 1], [], []>} : vector<1x40xf32>, vector<40x256xf32>, vector<1x256xf32> -> vector<1x256xf32>
    %149 = vector.broadcast %147 : vector<1x1xf32> to vector<1x256xf32>
    %150 = arith.addf %148, %149 : vector<1x256xf32>
    %cst_85 = arith.constant dense<0.000000e+00> : vector<1x256xf32>
    %151 = tpu.matmul %146, %145, %cst_85 {dimension_numbers = #tpu.dot_dimension_numbers<[1], [0], [0], [1], [0, 0, 1, 1], [], []>} : vector<1x40xf32>, vector<40x256xf32>, vector<1x256xf32> -> vector<1x256xf32>
    %152 = vector.broadcast %147 : vector<1x1xf32> to vector<1x256xf32>
    %153 = arith.addf %151, %152 : vector<1x256xf32>
    %cst_86 = arith.constant 0.000000e+00 : f32
    %154 = vector.broadcast %cst_86 : f32 to vector<1x256xf32>
    %155 = arith.maximumf %150, %154 : vector<1x256xf32>
    %156 = math.absf %150 : vector<1x256xf32>
    %cst_87 = arith.constant 0.000000e+00 : f32
    %157 = vector.broadcast %cst_87 : f32 to vector<1x256xf32>
    %158 = arith.subf %157, %156 : vector<1x256xf32>
    %159 = math.exp %158 : vector<1x256xf32>
    %160 = math.log1p %159 : vector<1x256xf32>
    %161 = arith.addf %155, %160 : vector<1x256xf32>
    %cst_88 = arith.constant 0.000000e+00 : f32
    %162 = vector.broadcast %cst_88 : f32 to vector<1x256xf32>
    %163 = arith.maximumf %153, %162 : vector<1x256xf32>
    %164 = math.absf %153 : vector<1x256xf32>
    %cst_89 = arith.constant 0.000000e+00 : f32
    %165 = vector.broadcast %cst_89 : f32 to vector<1x256xf32>
    %166 = arith.subf %165, %164 : vector<1x256xf32>
    %167 = math.exp %166 : vector<1x256xf32>
    %168 = math.log1p %167 : vector<1x256xf32>
    %169 = arith.addf %163, %168 : vector<1x256xf32>
    %cst_90 = arith.constant 0.000000e+00 : f32
    %170 = vector.broadcast %cst_90 : f32 to vector<1x256xf32>
    %171 = arith.subf %170, %161 : vector<1x256xf32>
    %c0_91 = arith.constant 0 : index
    %c0_92 = arith.constant 0 : index
    %172 = vector.load %arg8[%c0_91, %c0_92] : memref<2x512xf32, #tpu.memory_space<vmem>>, vector<1x256xf32>
    tpu.vector_store %arg8[%c0_91, %c0_92], %171 {strides = array<i32>} : memref<2x512xf32, #tpu.memory_space<vmem>>, vector<1x256xf32>,
    %173 = arith.subf %150, %161 : vector<1x256xf32>
    %c1_93 = arith.constant 1 : index
    %c0_94 = arith.constant 0 : index
    %174 = vector.load %arg8[%c1_93, %c0_94] : memref<2x512xf32, #tpu.memory_space<vmem>>, vector<1x256xf32>
    tpu.vector_store %arg8[%c1_93, %c0_94], %173 {strides = array<i32>} : memref<2x512xf32, #tpu.memory_space<vmem>>, vector<1x256xf32>,
    %cst_95 = arith.constant 0.000000e+00 : f32
    %175 = vector.broadcast %cst_95 : f32 to vector<1x256xf32>
    %176 = arith.subf %175, %169 : vector<1x256xf32>
    %c0_96 = arith.constant 0 : index
    %c256_97 = arith.constant 256 : index
    %177 = vector.load %arg8[%c0_96, %c256_97] : memref<2x512xf32, #tpu.memory_space<vmem>>, vector<1x256xf32>
    tpu.vector_store %arg8[%c0_96, %c256_97], %176 {strides = array<i32>} : memref<2x512xf32, #tpu.memory_space<vmem>>, vector<1x256xf32>,
    %178 = arith.subf %153, %169 : vector<1x256xf32>
    %c1_98 = arith.constant 1 : index
    %c256_99 = arith.constant 256 : index
    %179 = vector.load %arg8[%c1_98, %c256_99] : memref<2x512xf32, #tpu.memory_space<vmem>>, vector<1x256xf32>
    tpu.vector_store %arg8[%c1_98, %c256_99], %178 {strides = array<i32>} : memref<2x512xf32, #tpu.memory_space<vmem>>, vector<1x256xf32>,
    return
  }
  func.func @transform_0(%arg0: i32) -> (i32, i32) {
    %c0_i32 = arith.constant 0 : i32
    %c0_i32_0 = arith.constant 0 : i32
    return %c0_i32, %arg0 : i32, i32
  }
  func.func @transform_1(%arg0: i32) -> (i32, i32) {
    %c0_i32 = arith.constant 0 : i32
    %c0_i32_0 = arith.constant 0 : i32
    %c0_i32_1 = arith.constant 0 : i32
    return %c0_i32, %c0_i32_0 : i32, i32
  }
  func.func @transform_2(%arg0: i32) -> (i32, i32) {
    %c0_i32 = arith.constant 0 : i32
    %c0_i32_0 = arith.constant 0 : i32
    %c0_i32_1 = arith.constant 0 : i32
    return %c0_i32, %c0_i32_0 : i32, i32
  }
  func.func @transform_3(%arg0: i32) -> (i32, i32, i32) {
    %c0_i32 = arith.constant 0 : i32
    %c0_i32_0 = arith.constant 0 : i32
    %c0_i32_1 = arith.constant 0 : i32
    %c0_i32_2 = arith.constant 0 : i32
    return %c0_i32, %c0_i32_0, %c0_i32_1 : i32, i32, i32
  }
  func.func @transform_4(%arg0: i32) -> (i32, i32, i32) {
    %c0_i32 = arith.constant 0 : i32
    %c0_i32_0 = arith.constant 0 : i32
    %c0_i32_1 = arith.constant 0 : i32
    %c0_i32_2 = arith.constant 0 : i32
    return %c0_i32, %c0_i32_0, %c0_i32_1 : i32, i32, i32
  }
  func.func @transform_5(%arg0: i32) -> (i32, i32) {
    %c0_i32 = arith.constant 0 : i32
    %c0_i32_0 = arith.constant 0 : i32
    %c0_i32_1 = arith.constant 0 : i32
    return %c0_i32, %c0_i32_0 : i32, i32
  }
  func.func @transform_6(%arg0: i32) -> (i32, i32) {
    %c0_i32 = arith.constant 0 : i32
    %c0_i32_0 = arith.constant 0 : i32
    %c0_i32_1 = arith.constant 0 : i32
    return %c0_i32, %c0_i32_0 : i32, i32
  }
  func.func @transform_7(%arg0: i32) -> (i32, i32) {
    %c0_i32 = arith.constant 0 : i32
    %c0_i32_0 = arith.constant 0 : i32
    return %c0_i32, %arg0 : i32, i32
  }
}

</mosaic_0001>

<bundles_post_ra>
// kernel: linear_mlp_forward.1
= control target key start
LH: loop header
LB: loop body
LE: loop exit
PB: predicated region body
PF: predicated region fallthrough
CT: control target
= control target key end

     0   :  { %s3399_s26 = smov 0   ;;  %s3956_s0 = inlined_call_operand.vmem [shape: f32[2,1024], index: 0, kind: input, shape index: {}]   ;;  %s3957_s1 = inlined_call_operand.vmem [shape: f32[40,2], index: 1, kind: input, shape index: {}]   ;;  %s3958_s2 = inlined_call_operand.vmem [shape: f32[40,1], index: 2, kind: input, shape index: {}]   ;;  %s3959_s3 = inlined_call_operand.vmem [shape: f32[8,40,40], index: 3, kind: input, shape index: {}]   ;;  %s3960_s4 = inlined_call_operand.vmem [shape: f32[8,40,1], index: 4, kind: input, shape index: {}]   ;;  %s3961_s5 = inlined_call_operand.vmem [shape: f32[1,40], index: 5, kind: input, shape index: {}]   ;;  %s3962_s6 = inlined_call_operand.<no memory space> [shape: f32[1,1], index: 6, kind: input, shape index: {}]   ;;  %s3963_s7 = inlined_call_operand.vmem [shape: f32[2,1024], index: 7, kind: output, shape index: {}]  }
   0x1   :  { %v12_v0 = vstv %s3962_s6 }
   0x2   :  { %13 = vst [vmem:[#allocation2] sm:$0x1] %v12_v0 }
   0x3 LB: > { %s2998_s27 = sadd.s32 4294967295, %s3350_s26   ;;  %p3002_p0 = scmp.ge.s32.totalorder %s3350_s26, 1  ;;  %s3350_s26 = sphi %s3399_s26, %s19_s26  }
   0x4   : > { %p240_p1 = scmp.lt.s32.totalorder %s3350_s26, 3 }
   0x6   : > { %p241_p2 = pnand %p3002_p0, %p240_p1 }
   0x7   : > { %v286_v1 = vld [vmem:[%s3957_s1 + $0x10] sm:$0xff] (!%p241_p2)  ;;  %v284_v2 = vld [vmem:[%s3957_s1] sm:$0xff] (!%p241_p2)  ;;  %v3352_v3 = vmov (!%p241_p2), 1   ;;  %v285_v4 = vld [vmem:[%s3957_s1 + $0x8] sm:$0xff] (!%p241_p2)  ;;  %v3353_v5 = vmov (!%p241_p2), 0   ;;  %v3354_v18 = vmov (!%p241_p2), 0.0   ;;  %v322_v51 = vlaneseq (!%p241_p2) }
   0x8   : > { %244 = sbr.rel (%p241_p2) target bundleno = 2336 (0x920), region = 48  ;;  %3322 = vset.pattern.permute.xlu0 (!%p241_p2), %v3352_v3  ;;  %3320 = vset.pattern.permute.xlu1 (!%p241_p2), %v3352_v3  ;;  %v287_v6 = vld [vmem:[%s3957_s1 + $0x18] sm:$0xff] (!%p241_p2)  ;;  %v290_v7 = vld [vmem:[%s3958_s2 + $0x8] sm:$0xff] (!%p241_p2)  ;;  %v289_v8 = vld [vmem:[%s3958_s2] sm:$0xff] (!%p241_p2)  ;;  %s3003_s6 = sshll.u32 (!%p241_p2), %s2998_s27, 2  ;;  %vm575_vm0 = vcmask (!%p241_p2), 326656  }
   0x9   : > { %359 = vperm.xlu0 (!%p241_p2), %3322, %v286_v1   ;;  %351 = vperm.xlu1 (!%p241_p2), %3320, %v284_v2   ;;  %v288_v9 = vld [vmem:[%s3957_s1 + $0x20] sm:$0xff] (!%p241_p2)  ;;  %v291_v10 = vld [vmem:[%s3958_s2 + $0x10] sm:$0xff] (!%p241_p2)  ;;  %v292_v12 = vld [vmem:[%s3958_s2 + $0x18] sm:$0xff] (!%p241_p2)  ;;  %p273_p3 = scmp.lt.s32.totalorder (!%p241_p2), %s3003_s6, 7  ;;  %v3559_v53 = vshrl.u32 (!%p241_p2), %v322_v51, 7  ;;  %vm2873_vm5 = vcmp.lt.s32.totalorder (!%p241_p2), %v322_v51, 256 }
   0xa   : > { %v293_v11 = vld [vmem:[%s3958_s2 + $0x20] sm:$0xff] (!%p241_p2)  ;;  %v546_v13 = vld [vmem:[%s3960_s4 + $0x8] sm:$0xff] (!%p241_p2)  ;;  %v548_v14 = vld [vmem:[%s3960_s4 + $0x18] sm:$0xff] (!%p241_p2)  ;;  %655 = vmatprep.mubr.f32.mxu0 (!%p241_p2), %v3354_v18  ;;  %760 = vmatprep.mubr.f32.mxu1 (!%p241_p2), %v3354_v18 }
   0xb   : > { %v3022_v15 = vld [vmem:[%s3960_s4 + $0x28] sm:$0xff] (!%p241_p2)  ;;  %v3024_v16 = vld [vmem:[%s3960_s4 + $0x38] sm:$0xff] (!%p241_p2)  ;;  %v545_v21 = vld [vmem:[%s3960_s4] sm:$0xff] (!%p241_p2)  ;;  %v372_v55 = vsub.s32 (!%p241_p2), 1, %v3559_v53  ;;  %v376_v56 = vsub.s32 (!%p241_p2), 3, %v3559_v53  ;;  %v3572_v59 = vsub.s32 (!%p241_p2), 0, %v3559_v53 }
   0xc   : > { %v3026_v17 = vld [vmem:[%s3960_s4 + $0x48] sm:$0xff] (!%p241_p2)  ;;  %v3043_v19 = vld [vmem:[%s3960_s4 + $0x58] sm:$0xff] (!%p241_p2)  ;;  %v547_v23 = vld [vmem:[%s3960_s4 + $0x10] sm:$0xff] (!%p241_p2)  ;;  %v328_v60 = vsub.s32 (!%p241_p2), 2, %v3559_v53 }
   0xd   : > { %3323 = vset.pattern.permute.xlu0 (!%p241_p2), %v3353_v5  ;;  %355 = vperm.xlu1 (!%p241_p2), %3320, %v285_v4   ;;  %v3045_v20 = vld [vmem:[%s3960_s4 + $0x68] sm:$0xff] (!%p241_p2)  ;;  %v3062_v22 = vld [vmem:[%s3960_s4 + $0x78] sm:$0xff] (!%p241_p2)  ;;  %v549_v25 = vld [vmem:[%s3960_s4 + $0x20] sm:$0xff] (!%p241_p2) }
   0xe   : > { %298 = vperm.xlu0 (!%p241_p2), %3323, %v284_v2   ;;  %v3064_v24 = vld [vmem:[%s3960_s4 + $0x88] sm:$0xff] (!%p241_p2)  ;;  %v3066_v26 = vld [vmem:[%s3960_s4 + $0x98] sm:$0xff] (!%p241_p2)  ;;  %v3023_v27 = vld [vmem:[%s3960_s4 + $0x30] sm:$0xff] (!%p241_p2) }
   0xf   : > { %v3083_v28 = vld [vmem:[%s3960_s4 + $0xa8] sm:$0xff]  ;;  %v3025_v29 = vld [vmem:[%s3960_s4 + $0x40] sm:$0xff]  ;;  %v3085_v30 = vld [vmem:[%s3960_s4 + $0xb8] sm:$0xff]  ;;  %s3965_s6 = smov (!%p273_p3, %s3003_s6), 7 }
  0x10   : > { %v3042_v31 = vld [vmem:[%s3960_s4 + $0x50] sm:$0xff]  ;;  %v3102_v32 = vld [vmem:[%s3960_s4 + $0xc8] sm:$0xff]  ;;  %v3044_v33 = vld [vmem:[%s3960_s4 + $0x60] sm:$0xff]  ;;  %s3004_s27 = sshll.u32 %s3965_s6, 1 }
  0x11   : > { %3321 = vset.pattern.permute.xlu1 %v3353_v5  ;;  %v3104_v34 = vld [vmem:[%s3960_s4 + $0xd8] sm:$0xff]  ;;  %v3046_v35 = vld [vmem:[%s3960_s4 + $0x70] sm:$0xff]  ;;  %v3106_v36 = vld [vmem:[%s3960_s4 + $0xe8] sm:$0xff]  ;;  %s276_s15 = scalar_lea.vmem %s3956_s0, %s3004_s27  ;;  %s282_s20 = scalar_lea.vmem %s3963_s7, %s3004_s27 }
  0x12   : > { %303 = vperm.xlu0 %3323, %v285_v4   ;;  %313 = vperm.xlu1 %3321, %v287_v6   ;;  %v3063_v37 = vld [vmem:[%s3960_s4 + $0x80] sm:$0xff]  ;;  %v3123_v38 = vld [vmem:[%s3960_s4 + $0xf8] sm:$0xff]  ;;  %v3065_v39 = vld [vmem:[%s3960_s4 + $0x90] sm:$0xff] }
  0x13   : > { %v3125_v40 = vld [vmem:[%s3960_s4 + $0x108] sm:$0xff]  ;;  %v3082_v41 = vld [vmem:[%s3960_s4 + $0xa0] sm:$0xff]  ;;  %v3142_v42 = vld [vmem:[%s3960_s4 + $0x118] sm:$0xff] }
  0x14   : > { %v3084_v43 = vld [vmem:[%s3960_s4 + $0xb0] sm:$0xff]  ;;  %v3144_v44 = vld [vmem:[%s3960_s4 + $0x128] sm:$0xff]  ;;  %v3086_v45 = vld [vmem:[%s3960_s4 + $0xc0] sm:$0xff] }
  0x15   : > { %v3146_v46 = vld [vmem:[%s3960_s4 + $0x138] sm:$0xff]  ;;  %v3103_v47 = vld [vmem:[%s3960_s4 + $0xd0] sm:$0xff]  ;;  %v3105_v48 = vld [vmem:[%s3960_s4 + $0xe0] sm:$0xff] }
  0x16   : > { %308 = vperm.xlu0 %3323, %v286_v1   ;;  %3324 = vset.pattern.permute.xlu1 %v3352_v3  ;;  %v3122_v49 = vld [vmem:[%s3960_s4 + $0xf0] sm:$0xff]  ;;  %v3124_v50 = vld [vmem:[%s3960_s4 + $0x100] sm:$0xff] }
  0x17   : > { %363 = vperm.xlu1 %3324, %v287_v6   ;;  %v3126_v52 = vld [vmem:[%s3960_s4 + $0x110] sm:$0xff]  ;;  %v3143_v54 = vld [vmem:[%s3960_s4 + $0x120] sm:$0xff] }
  0x18   : > { %v294_v57 = vld [vmem:[%s276_s15] sm:$0xf]  ;;  %v295_v58 = vld [vmem:[%s276_s15 + $0x4] sm:$0xf]  ;;  %v3145_v61 = vld [vmem:[%s3960_s4 + $0x130] sm:$0xff] }
  0x19   : > { %v373_v0 = vrot.slane %v294_v57, %v372_v55  ;;  %v377_v1 = vrot.slane %v294_v57, %v376_v56  ;;  %v485_v2 = vrot.slane %v295_v58, %v372_v55  ;;  %v325_v4 = vrot.slane %v294_v57, %v3572_v59 }
  0x1a   : > { %415 = vperm.xlu0 %3323, %v290_v7   ;;  %v457_v6 = vrot.slane %v295_v58, %v3572_v59  ;;  %v461_v7 = vrot.slane %v295_v58, %v328_v60 }
  0x1b   : > { %3325 = vset.pattern.permute.xlu1 %v3353_v5 }
  0x1c   : > { %410 = vperm.xlu1 %3325, %v289_v8   ;;  %v2636_v8 = vld [vmem:[#allocation2] sm:$0x1] }
  0x1e   : > { %318 = vperm.xlu0 %3323, %v288_v9  }
  0x20   : > { %420 = vperm.xlu1 %3325, %v291_v10   ;;  %v3580_v10 = vrot.slane %v373_v0, %v372_v55 }
  0x22   : > { %430 = vperm.xlu0 %3323, %v293_v11   ;;  %v3582_v11 = vrot.slane %v377_v1, %v372_v55 }
  0x24   : > { %425 = vperm.xlu1 %3325, %v292_v12   ;;  %v3584_v12 = vrot.slane %v485_v2, %v372_v55 }
  0x26   : > { %557 = vperm.xlu0 %3323, %v546_v13  }
  0x28   : > { %3326 = vset.pattern.permute.xlu1 %v3352_v3  ;;  %v489_v3 = vrot.slane %v295_v58, %v376_v56 }
  0x29   : > { %367 = vperm.xlu1 %3326, %v288_v9  }
  0x2a   : > { %567 = vperm.xlu0 %3323, %v548_v14   ;;  %v3586_v13 = vrot.slane %v489_v3, %v372_v55 }
  0x2d   : > { %3327 = vset.pattern.permute.xlu1 %v3353_v5  ;;  %v329_v5 = vrot.slane %v294_v57, %v328_v60 }
  0x2e   : > { %815 = vperm.xlu0 %3323, %v3022_v15   ;;  %552 = vperm.xlu1 %3327, %v545_v21   ;;  %v3589_v15 = vrot.slane %v325_v4, %v3572_v59 }
  0x32   : > { %825 = vperm.xlu0 %3323, %v3024_v16   ;;  %562 = vperm.xlu1 %3327, %v547_v23   ;;  %v3592_v16 = vrot.slane %v329_v5, %v3572_v59 }
  0x36   : > { %835 = vperm.xlu0 %3323, %v3026_v17   ;;  %572 = vperm.xlu1 %3327, %v549_v25   ;;  %v3595_v17 = vrot.slane %v457_v6, %v3572_v59 }
  0x3a   : > { %1082 = vperm.xlu0 %3323, %v3043_v19   ;;  %820 = vperm.xlu1 %3327, %v3023_v27   ;;  %v3598_v19 = vrot.slane %v461_v7, %v3572_v59 }
  0x3e   : > { %1092 = vperm.xlu0 %3323, %v3045_v20   ;;  %830 = vperm.xlu1 %3327, %v3025_v29  }
  0x42   : > { %1339 = vperm.xlu0 %3323, %v3062_v22   ;;  %1077 = vperm.xlu1 %3327, %v3042_v31  }
  0x46   : > { %1349 = vperm.xlu0 %3323, %v3064_v24   ;;  %1087 = vperm.xlu1 %3327, %v3044_v33  }
  0x4a   : > { %1359 = vperm.xlu0 %3323, %v3066_v26   ;;  %1097 = vperm.xlu1 %3327, %v3046_v35  }
  0x4e   : > { %1606 = vperm.xlu0 %3323, %v3083_v28   ;;  %1344 = vperm.xlu1 %3327, %v3063_v37  }
  0x52   : > { %1616 = vperm.xlu0 %3323, %v3085_v30   ;;  %1354 = vperm.xlu1 %3327, %v3065_v39  }
  0x56   : > { %1863 = vperm.xlu0 %3323, %v3102_v32   ;;  %1601 = vperm.xlu1 %3327, %v3082_v41  }
  0x5a   : > { %1873 = vperm.xlu0 %3323, %v3104_v34   ;;  %1611 = vperm.xlu1 %3327, %v3084_v43  }
  0x5e   : > { %1883 = vperm.xlu0 %3323, %v3106_v36   ;;  %1621 = vperm.xlu1 %3327, %v3086_v45  }
  0x62   : > { %2130 = vperm.xlu0 %3323, %v3123_v38   ;;  %1868 = vperm.xlu1 %3327, %v3103_v47  }
  0x66   : > { %2140 = vperm.xlu0 %3323, %v3125_v40   ;;  %1878 = vperm.xlu1 %3327, %v3105_v48  }
  0x6a   : > { %2387 = vperm.xlu0 %3323, %v3142_v42   ;;  %2125 = vperm.xlu1 %3327, %v3122_v49  }
  0x6e   : > { %2397 = vperm.xlu0 %3323, %v3144_v44   ;;  %2135 = vperm.xlu1 %3327, %v3124_v50  }
  0x72   : > { %2407 = vperm.xlu0 %3323, %v3146_v46   ;;  %2145 = vperm.xlu1 %3327, %v3126_v52  }
  0x76   : > { %2392 = vperm.xlu1 %3327, %v3143_v54  }
  0x7a   : > { %2402 = vperm.xlu1 %3327, %v3145_v61  }
  0x7e   : > { %2639 = vperm.xlu1 %3327, %v2636_v8  }
  0x88   : > { %v352_v62 = vpop.permute.xlu1 %351  ;;  %v360_v63 = vpop.permute.xlu0 %359 }
  0x89   : > { %v388_v20 = vmul.f32 %v3580_v10, %v352_v62  ;;  %v389_v21 = vmul.f32 %v3582_v11, %v352_v62  ;;  %v500_v22 = vmul.f32 %v3584_v12, %v352_v62  ;;  %v501_v23 = vmul.f32 %v3586_v13, %v352_v62 }
  0x8a   : > { %v392_v30 = vmul.f32 %v3580_v10, %v360_v63  ;;  %v393_v31 = vmul.f32 %v3582_v11, %v360_v63  ;;  %v504_v34 = vmul.f32 %v3584_v12, %v360_v63  ;;  %v505_v35 = vmul.f32 %v3586_v13, %v360_v63 }
  0x8c   : > { %v356_v9 = vpop.permute.xlu1 %355 }
  0x8d   : > { %v299_v14 = vpop.permute.xlu0 %298  ;;  %v390_v38 = vmul.f32 %v3580_v10, %v356_v9  ;;  %v391_v39 = vmul.f32 %v3582_v11, %v356_v9  ;;  %v502_v40 = vmul.f32 %v3584_v12, %v356_v9  ;;  %v503_v41 = vmul.f32 %v3586_v13, %v356_v9 }
  0x8e   : > { %v340_v26 = vmul.f32 %v3589_v15, %v299_v14  ;;  %v341_v27 = vmul.f32 %v3592_v16, %v299_v14  ;;  %v472_v28 = vmul.f32 %v3595_v17, %v299_v14  ;;  %v473_v29 = vmul.f32 %v3598_v19, %v299_v14 }
  0x90   : > { %v399_v44 = vadd.f32 %v389_v21, %v341_v27  ;;  %v511_v45 = vadd.f32 %v501_v23, %v473_v29  ;;  %v398_v46 = vadd.f32 %v388_v20, %v340_v26  ;;  %v510_v47 = vadd.f32 %v500_v22, %v472_v28 }
  0x91   : > { %v304_v24 = vpop.permute.xlu0 %303  ;;  %v314_v25 = vpop.permute.xlu1 %313 }
  0x92   : > { %v343_v32 = vmul.f32 %v3592_v16, %v304_v24  ;;  %v475_v33 = vmul.f32 %v3598_v19, %v304_v24  ;;  %v342_v36 = vmul.f32 %v3589_v15, %v304_v24  ;;  %v474_v37 = vmul.f32 %v3595_v17, %v304_v24 }
  0x93   : > { %v346_v48 = vmul.f32 %v3589_v15, %v314_v25  ;;  %v347_v49 = vmul.f32 %v3592_v16, %v314_v25  ;;  %v478_v58 = vmul.f32 %v3595_v17, %v314_v25  ;;  %v479_v60 = vmul.f32 %v3598_v19, %v314_v25 }
  0x94   : > { %v401_v50 = vadd.f32 %v391_v39, %v343_v32  ;;  %v513_v52 = vadd.f32 %v503_v41, %v475_v33  ;;  %v400_v56 = vadd.f32 %v390_v38, %v342_v36  ;;  %v512_v57 = vadd.f32 %v502_v40, %v474_v37 }
  0x95   : > { %v309_v42 = vpop.permute.xlu0 %308 }
  0x96   : > { %v364_v43 = vpop.permute.xlu1 %363  ;;  %v344_v54 = vmul.f32 %v3589_v15, %v309_v42  ;;  %v345_v55 = vmul.f32 %v3592_v16, %v309_v42  ;;  %v476_v61 = vmul.f32 %v3595_v17, %v309_v42  ;;  %v477_v62 = vmul.f32 %v3598_v19, %v309_v42 }
  0x97   : > { %v394_v4 = vmul.f32 %v3580_v10, %v364_v43  ;;  %v395_v5 = vmul.f32 %v3582_v11, %v364_v43  ;;  %v506_v6 = vmul.f32 %v3584_v12, %v364_v43  ;;  %v507_v7 = vmul.f32 %v3586_v13, %v364_v43 }
  0x98   : > { %v402_v9 = vadd.f32 %v392_v30, %v344_v54  ;;  %v403_v14 = vadd.f32 %v393_v31, %v345_v55  ;;  %v514_v22 = vadd.f32 %v504_v34, %v476_v61  ;;  %v515_v23 = vadd.f32 %v505_v35, %v477_v62 }
  0x99   : > { %v416_v63 = vpop.permute.xlu0 %415  ;;  %v404_v35 = vadd.f32 %v394_v4, %v346_v48 }
  0x9a   : > { %v436_v0 = vadd.f32 %v416_v63, %v401_v50  ;;  %v523_v1 = vadd.f32 %v513_v52, %v416_v63  ;;  %v435_v2 = vadd.f32 %v416_v63, %v400_v56  ;;  %v522_v3 = vadd.f32 %v512_v57, %v416_v63 }
  0x9b   : > { %v411_v8 = vpop.permute.xlu1 %410 }
  0x9c   : > { %v434_v20 = vadd.f32 %v411_v8, %v399_v44  ;;  %v521_v21 = vadd.f32 %v511_v45, %v411_v8  ;;  %v433_v24 = vadd.f32 %v411_v8, %v398_v46  ;;  %v520_v25 = vadd.f32 %v510_v47, %v411_v8 }
  0x9d   : > { %v446_v26 = vmax.f32 %v436_v0, 0.0  ;;  %v533_v27 = vmax.f32 %v523_v1, 0.0  ;;  %v445_v28 = vmax.f32 %v435_v2, 0.0  ;;  %v532_v29 = vmax.f32 %v522_v3, 0.0  ;;  %v319_v50 = vpop.permute.xlu0 %318 }
  0x9e   : > { %v444_v33 = vmax.f32 %v434_v20, 0.0  ;;  %v531_v36 = vmax.f32 %v521_v21, 0.0  ;;  %v443_v37 = vmax.f32 %v433_v24, 0.0  ;;  %v530_v38 = vmax.f32 %v520_v25, 0.0 }
  0x9f   : > { %v421_v32 = vpop.permute.xlu1 %420  ;;  %v405_v44 = vadd.f32 %v395_v5, %v347_v49  ;;  %v516_v45 = vadd.f32 %v506_v6, %v478_v58  ;;  %v517_v46 = vadd.f32 %v507_v7, %v479_v60  ;;  %v348_v58 = vmul.f32 %v3589_v15, %v319_v50 }
  0xa0   : > { %v437_v39 = vadd.f32 %v421_v32, %v402_v9  ;;  %v438_v40 = vadd.f32 %v421_v32, %v403_v14  ;;  %v524_v41 = vadd.f32 %v514_v22, %v421_v32  ;;  %v525_v30 = vadd.f32 %v515_v23, %v421_v32  ;;  %v543_v32 = vld [vmem:[%s3959_s3 + $0x18] sm:$0xff] }
  0xa1   : > { %v3164_v31 = vpack.c.bf16 %v446_v26, %v444_v33  ;;  %v3172_v42 = vpack.c.bf16 %v533_v27, %v531_v36  ;;  %v3166_v43 = vpack.c.bf16 %v445_v28, %v443_v37  ;;  %v3174_v34 = vpack.c.bf16 %v532_v29, %v530_v38  ;;  %v431_v22 = vpop.permute.xlu0 %430  ;;  %v542_v29 = vld [vmem:[%s3959_s3 + $0x10] sm:$0xff]  ;;  %v544_v33 = vld [vmem:[%s3959_s3 + $0x20] sm:$0xff] }
  0xa2   : > { %v448_v57 = vmax.f32 %v438_v40, 0.0  ;;  %v535_v61 = vmax.f32 %v525_v30, 0.0  ;;  %v447_v62 = vmax.f32 %v437_v39, 0.0  ;;  %v534_v63 = vmax.f32 %v524_v41, 0.0 }
  0xa3   : > { %3165 = vmatprep.subr.bf16.mxu0 %v3164_v31  ;;  %3173 = vmatprep.subr.bf16.mxu1 %v3172_v42  ;;  %v426_v47 = vpop.permute.xlu1 %425  ;;  %v349_v60 = vmul.f32 %v3592_v16, %v319_v50  ;;  %v481_v2 = vmul.f32 %v3598_v19, %v319_v50  ;;  %v480_v21 = vmul.f32 %v3595_v17, %v319_v50  ;;  %v541_v17 = vld [vmem:[%s3959_s3 + $0x8] sm:$0xff] }
  0xa4   : > { %v439_v52 = vadd.f32 %v426_v47, %v404_v35  ;;  %v440_v54 = vadd.f32 %v426_v47, %v405_v44  ;;  %v526_v55 = vadd.f32 %v516_v45, %v426_v47  ;;  %v527_v56 = vadd.f32 %v517_v46, %v426_v47  ;;  %3167 = vmatpush1.bf16.msra.mxu0 %v3166_v43 }
  0xa5   : > { %3175 = vmatpush1.bf16.msra.mxu1 %v3174_v34  ;;  %v558_v41 = vpop.permute.xlu0 %557 }
  0xa6   : > { %v450_v0 = vmax.f32 %v440_v54, 0.0  ;;  %v537_v1 = vmax.f32 %v527_v56, 0.0  ;;  %v449_v48 = vmax.f32 %v439_v52, 0.0  ;;  %v536_v49 = vmax.f32 %v526_v55, 0.0 }
  0xa8   : > { %v368_v3 = vpop.permute.xlu1 %367  ;;  %v3168_v4 = vpack.c.bf16 %v450_v0, %v448_v57  ;;  %v3176_v5 = vpack.c.bf16 %v537_v1, %v535_v61  ;;  %v3170_v6 = vpack.c.bf16 %v449_v48, %v447_v62  ;;  %v3178_v7 = vpack.c.bf16 %v536_v49, %v534_v63 }
  0xa9   : > { %v396_v8 = vmul.f32 %v3580_v10, %v368_v3  ;;  %v397_v9 = vmul.f32 %v3582_v11, %v368_v3  ;;  %v508_v14 = vmul.f32 %v3584_v12, %v368_v3  ;;  %v509_v20 = vmul.f32 %v3586_v13, %v368_v3  ;;  %v540_v13 = vld [vmem:[%s3959_s3] sm:$0xff] }
  0xaa   : > { %3169 = vmatprep.subr.bf16.mxu0 %v3168_v4  ;;  %3177 = vmatprep.subr.bf16.mxu1 %v3176_v5 }
  0xab   : > { %3171 = vmatpush1.bf16.msra.mxu0 %v3170_v6  ;;  %3179 = vmatpush1.bf16.msra.mxu1 %v3178_v7  ;;  %v407_v15 = vadd.f32 %v397_v9, %v349_v60  ;;  %v519_v16 = vadd.f32 %v509_v20, %v481_v2  ;;  %v406_v19 = vadd.f32 %v396_v8, %v348_v58  ;;  %v568_v6 = vpop.permute.xlu0 %567 }
  0xac   : > { %v518_v23 = vadd.f32 %v508_v14, %v480_v21 }
  0xad   : > { %v442_v24 = vadd.f32 %v431_v22, %v407_v15  ;;  %v529_v25 = vadd.f32 %v519_v16, %v431_v22  ;;  %v441_v10 = vadd.f32 %v431_v22, %v406_v19  ;;  %v553_v36 = vpop.permute.xlu1 %552 }
  0xae   : > { %v528_v26 = vadd.f32 %v518_v23, %v431_v22 }
  0xaf   : > { %v452_v11 = vmax.f32 %v442_v24, 0.0  ;;  %v539_v27 = vmax.f32 %v529_v25, 0.0  ;;  %v451_v12 = vmax.f32 %v441_v10, 0.0 }
  0xb0   : > { %v538_v28 = vmax.f32 %v528_v26, 0.0 }
  0xb1   : > { %599 = vmatprep.subr.mxu0 %v452_v11  ;;  %704 = vmatprep.subr.mxu1 %v539_v27  ;;  %v563_v54 = vpop.permute.xlu1 %562 }
  0xb2   : > { %600 = vmatpush1.msra.mxu0 %v451_v12  ;;  %705 = vmatpush1.msra.mxu1 %v538_v28 }
  0xb3   : > { %3007 = vmatmul.mubr.msk.f32.vlgmr.msra.gmra.mrb[0].mxu0 %vm575_vm0, %v540_v13  ;;  %3012 = vmatmul.mubr.msk.f32.vlgmr.msra.gmra.mrb[0].mxu1 %vm575_vm0, %v540_v13 }
  0xb4   : > { %661 = vmatprep.mubr.f32.mxu0 %v3354_v18  ;;  %766 = vmatprep.mubr.f32.mxu1 %v3354_v18 }
  0xb5   : > { %v573_v25 = vpop.permute.xlu1 %572 }
  0xb7   : > { %3008 = vmatmul.mubr.msk.f32.gmra.mrb[2].mxu0 %vm575_vm0, %v541_v17  ;;  %3013 = vmatmul.mubr.msk.f32.gmra.mrb[2].mxu1 %vm575_vm0, %v541_v17 }
  0xb8   : > { %667 = vmatprep.mubr.f32.mxu0 %v3354_v18  ;;  %772 = vmatprep.mubr.f32.mxu1 %v3354_v18 }
  0xbb   : > { %3009 = vmatmul.mubr.msk.f32.gmra.mrb[4].mxu0 %vm575_vm0, %v542_v29  ;;  %3014 = vmatmul.mubr.msk.f32.gmra.mrb[4].mxu1 %vm575_vm0, %v542_v29 }
  0xbc   : > { %673 = vmatprep.mubr.f32.mxu0 %v3354_v18  ;;  %778 = vmatprep.mubr.f32.mxu1 %v3354_v18 }
  0xbf   : > { %3010 = vmatmul.mubr.msk.f32.gmra.mrb[6].mxu0 %vm575_vm0, %v543_v32  ;;  %3015 = vmatmul.mubr.msk.f32.gmra.mrb[6].mxu1 %vm575_vm0, %v543_v32 }
  0xc0   : > { %679 = vmatprep.mubr.f32.mxu0 %v3354_v18  ;;  %784 = vmatprep.mubr.f32.mxu1 %v3354_v18 }
  0xc3   : > { %3011 = vmatmul.mubr.msk.f32.gmra.mrb[8].mxu0 %vm575_vm0, %v544_v33  ;;  %3016 = vmatmul.mubr.msk.f32.gmra.mrb[8].mxu1 %vm575_vm0, %v544_v33 }
  0xc4   : > { %917 = vmatprep.mubr.f32.mxu0 %v3354_v18  ;;  %1022 = vmatprep.mubr.f32.mxu1 %v3354_v18 }
 0x186   : > { %v657_v37 = vpop.f32.mrb[0].mxu0  ;;  %v762_v38 = vpop.f32.mrb[0].mxu1 }
 0x187   : > { %v659_v39 = vpop.f32.mrb[1].mxu0  ;;  %v764_v40 = vpop.f32.mrb[1].mxu1  ;;  %v658_v30 = vadd.f32 %v657_v37, %v553_v36  ;;  %v763_v31 = vadd.f32 %v762_v38, %v553_v36 }
 0x188   : > { %v660_v42 = vadd.f32 %v659_v39, %v553_v36  ;;  %v765_v43 = vadd.f32 %v764_v40, %v553_v36 }
 0x189   : > { %v686_v55 = vmax.f32 %v658_v30, 0.0  ;;  %v791_v56 = vmax.f32 %v763_v31, 0.0 }
 0x18a   : > { %v663_v34 = vpop.f32.mrb[2].mxu0  ;;  %v768_v35 = vpop.f32.mrb[2].mxu1  ;;  %v687_v62 = vmax.f32 %v660_v42, 0.0  ;;  %v792_v63 = vmax.f32 %v765_v43, 0.0 }
 0x18b   : > { %v664_v44 = vadd.f32 %v663_v34, %v558_v41  ;;  %v769_v45 = vadd.f32 %v768_v35, %v558_v41  ;;  %v665_v46 = vpop.f32.mrb[3].mxu0  ;;  %v770_v47 = vpop.f32.mrb[3].mxu1 }
 0x18c   : > { %v666_v50 = vadd.f32 %v665_v46, %v558_v41  ;;  %v771_v52 = vadd.f32 %v770_v47, %v558_v41  ;;  %v3018_v46 = vld [vmem:[%s3959_s3 + $0x30] sm:$0xff]  ;;  %v3019_v47 = vld [vmem:[%s3959_s3 + $0x38] sm:$0xff] }
 0x18d   : > { %v688_v57 = vmax.f32 %v664_v44, 0.0  ;;  %v793_v61 = vmax.f32 %v769_v45, 0.0  ;;  %v3017_v45 = vld [vmem:[%s3959_s3 + $0x28] sm:$0xff] }
 0x18e   : > { %v689_v0 = vmax.f32 %v666_v50, 0.0  ;;  %v794_v1 = vmax.f32 %v771_v52, 0.0  ;;  %v669_v48 = vpop.f32.mrb[4].mxu0  ;;  %v774_v49 = vpop.f32.mrb[4].mxu1  ;;  %v3020_v50 = vld [vmem:[%s3959_s3 + $0x40] sm:$0xff]  ;;  %v3021_v52 = vld [vmem:[%s3959_s3 + $0x48] sm:$0xff] }
 0x18f   : > { %v3182_v58 = vpack.c.bf16 %v688_v57, %v686_v55  ;;  %v3190_v60 = vpack.c.bf16 %v793_v61, %v791_v56  ;;  %v671_v2 = vpop.f32.mrb[5].mxu0  ;;  %v776_v3 = vpop.f32.mrb[5].mxu1  ;;  %v670_v7 = vadd.f32 %v669_v48, %v563_v54  ;;  %v775_v8 = vadd.f32 %v774_v49, %v563_v54 }
 0x190   : > { %v3180_v4 = vpack.c.bf16 %v689_v0, %v687_v62  ;;  %v3188_v5 = vpack.c.bf16 %v794_v1, %v792_v63  ;;  %v672_v9 = vadd.f32 %v671_v2, %v563_v54  ;;  %v777_v14 = vadd.f32 %v776_v3, %v563_v54  ;;  %v816_v54 = vpop.permute.xlu0 %815  ;;  %v821_v62 = vpop.permute.xlu1 %820 }
 0x191   : > { %v690_v10 = vmax.f32 %v670_v7, 0.0  ;;  %v795_v26 = vmax.f32 %v775_v8, 0.0 }
 0x192   : > { %v675_v20 = vpop.f32.mrb[6].mxu0  ;;  %v780_v21 = vpop.f32.mrb[6].mxu1  ;;  %3181 = vmatprep.subr.bf16.mxu0 %v3180_v4  ;;  %3189 = vmatprep.subr.bf16.mxu1 %v3188_v5  ;;  %v691_v12 = vmax.f32 %v672_v9, 0.0  ;;  %v796_v28 = vmax.f32 %v777_v14, 0.0 }
 0x193   : > { %v676_v15 = vadd.f32 %v675_v20, %v568_v6  ;;  %v781_v16 = vadd.f32 %v780_v21, %v568_v6  ;;  %v677_v19 = vpop.f32.mrb[7].mxu0  ;;  %v782_v22 = vpop.f32.mrb[7].mxu1  ;;  %3183 = vmatpush1.bf16.msra.mxu0 %v3182_v58  ;;  %3191 = vmatpush1.bf16.msra.mxu1 %v3190_v60 }
 0x194   : > { %v678_v23 = vadd.f32 %v677_v19, %v568_v6  ;;  %v783_v24 = vadd.f32 %v782_v22, %v568_v6  ;;  %v826_v7 = vpop.permute.xlu0 %825 }
 0x195   : > { %v692_v11 = vmax.f32 %v676_v15, 0.0  ;;  %v797_v27 = vmax.f32 %v781_v16, 0.0 }
 0x196   : > { %v693_v13 = vmax.f32 %v678_v23, 0.0  ;;  %v798_v17 = vmax.f32 %v783_v24, 0.0  ;;  %v681_v29 = vpop.f32.mrb[8].mxu0  ;;  %v786_v32 = vpop.f32.mrb[8].mxu1 }
 0x197   : > { %v3186_v33 = vpack.c.bf16 %v692_v11, %v690_v10  ;;  %v3194_v36 = vpack.c.bf16 %v797_v27, %v795_v26  ;;  %v683_v37 = vpop.f32.mrb[9].mxu0  ;;  %v788_v38 = vpop.f32.mrb[9].mxu1  ;;  %v682_v31 = vadd.f32 %v681_v29, %v573_v25  ;;  %v787_v42 = vadd.f32 %v786_v32, %v573_v25 }
 0x198   : > { %v3184_v39 = vpack.c.bf16 %v693_v13, %v691_v12  ;;  %v3192_v40 = vpack.c.bf16 %v798_v17, %v796_v28  ;;  %v684_v41 = vadd.f32 %v683_v37, %v573_v25  ;;  %v789_v30 = vadd.f32 %v788_v38, %v573_v25  ;;  %v831_v12 = vpop.permute.xlu1 %830 }
 0x199   : > { %v694_v35 = vmax.f32 %v682_v31, 0.0  ;;  %v799_v44 = vmax.f32 %v787_v42, 0.0 }
 0x19a   : > { %v695_v43 = vmax.f32 %v684_v41, 0.0  ;;  %v800_v34 = vmax.f32 %v789_v30, 0.0  ;;  %3185 = vmatprep.subr.bf16.mxu0 %v3184_v39  ;;  %3193 = vmatprep.subr.bf16.mxu1 %v3192_v40  ;;  %v836_v30 = vpop.permute.xlu0 %835 }
 0x19b   : > { %3187 = vmatpush1.bf16.msra.mxu0 %v3186_v33  ;;  %3195 = vmatpush1.bf16.msra.mxu1 %v3194_v36 }
 0x19c   : > { %861 = vmatprep.subr.mxu0 %v695_v43  ;;  %966 = vmatprep.subr.mxu1 %v800_v34 }
 0x19f   : > { %862 = vmatpush1.msra.mxu0 %v694_v35  ;;  %967 = vmatpush1.msra.mxu1 %v799_v44 }
 0x1a0   : > { %3027 = vmatmul.mubr.msk.f32.vlgmr.msra.gmra.mrb[10].mxu0 %vm575_vm0, %v3017_v45  ;;  %3032 = vmatmul.mubr.msk.f32.vlgmr.msra.gmra.mrb[10].mxu1 %vm575_vm0, %v3017_v45 }
 0x1a1   : > { %923 = vmatprep.mubr.f32.mxu0 %v3354_v18  ;;  %1028 = vmatprep.mubr.f32.mxu1 %v3354_v18 }
 0x1a4   : > { %3028 = vmatmul.mubr.msk.f32.gmra.mrb[12].mxu0 %vm575_vm0, %v3018_v46  ;;  %3033 = vmatmul.mubr.msk.f32.gmra.mrb[12].mxu1 %vm575_vm0, %v3018_v46 }
 0x1a5   : > { %929 = vmatprep.mubr.f32.mxu0 %v3354_v18  ;;  %1034 = vmatprep.mubr.f32.mxu1 %v3354_v18 }
 0x1a8   : > { %3029 = vmatmul.mubr.msk.f32.gmra.mrb[14].mxu0 %vm575_vm0, %v3019_v47  ;;  %3034 = vmatmul.mubr.msk.f32.gmra.mrb[14].mxu1 %vm575_vm0, %v3019_v47 }
 0x1a9   : > { %935 = vmatprep.mubr.f32.mxu0 %v3354_v18  ;;  %1040 = vmatprep.mubr.f32.mxu1 %v3354_v18 }
 0x1ac   : > { %3030 = vmatmul.mubr.msk.f32.gmra.mrb[16].mxu0 %vm575_vm0, %v3020_v50  ;;  %3035 = vmatmul.mubr.msk.f32.gmra.mrb[16].mxu1 %vm575_vm0, %v3020_v50 }
 0x1ad   : > { %941 = vmatprep.mubr.f32.mxu0 %v3354_v18  ;;  %1046 = vmatprep.mubr.f32.mxu1 %v3354_v18 }
 0x1b0   : > { %3031 = vmatmul.mubr.msk.f32.gmra.mrb[18].mxu0 %vm575_vm0, %v3021_v52  ;;  %3036 = vmatmul.mubr.msk.f32.gmra.mrb[18].mxu1 %vm575_vm0, %v3021_v52 }
 0x1b1   : > { %1179 = vmatprep.mubr.f32.mxu0 %v3354_v18  ;;  %1284 = vmatprep.mubr.f32.mxu1 %v3354_v18 }
 0x273   : > { %v919_v55 = vpop.f32.mrb[10].mxu0  ;;  %v1024_v56 = vpop.f32.mrb[10].mxu1 }
 0x274   : > { %v921_v57 = vpop.f32.mrb[11].mxu0  ;;  %v1026_v61 = vpop.f32.mrb[11].mxu1  ;;  %v920_v63 = vadd.f32 %v919_v55, %v816_v54  ;;  %v1025_v0 = vadd.f32 %v1024_v56, %v816_v54 }
 0x275   : > { %v922_v1 = vadd.f32 %v921_v57, %v816_v54  ;;  %v1027_v48 = vadd.f32 %v1026_v61, %v816_v54 }
 0x276   : > { %v948_v8 = vmax.f32 %v920_v63, 0.0  ;;  %v1053_v9 = vmax.f32 %v1025_v0, 0.0 }
 0x277   : > { %v925_v49 = vpop.f32.mrb[12].mxu0  ;;  %v1030_v58 = vpop.f32.mrb[12].mxu1  ;;  %v949_v21 = vmax.f32 %v922_v1, 0.0  ;;  %v1054_v15 = vmax.f32 %v1027_v48, 0.0 }
 0x278   : > { %v926_v60 = vadd.f32 %v925_v49, %v821_v62  ;;  %v1031_v2 = vadd.f32 %v1030_v58, %v821_v62  ;;  %v927_v3 = vpop.f32.mrb[13].mxu0  ;;  %v1032_v4 = vpop.f32.mrb[13].mxu1 }
 0x279   : > { %v928_v5 = vadd.f32 %v927_v3, %v821_v62  ;;  %v1033_v6 = vadd.f32 %v1032_v4, %v821_v62  ;;  %v3038_v3 = vld [vmem:[%s3959_s3 + $0x58] sm:$0xff]  ;;  %v3039_v4 = vld [vmem:[%s3959_s3 + $0x60] sm:$0xff] }
 0x27a   : > { %v950_v14 = vmax.f32 %v926_v60, 0.0  ;;  %v1055_v20 = vmax.f32 %v1031_v2, 0.0  ;;  %v3037_v2 = vld [vmem:[%s3959_s3 + $0x50] sm:$0xff] }
 0x27b   : > { %v951_v16 = vmax.f32 %v928_v5, 0.0  ;;  %v1056_v19 = vmax.f32 %v1033_v6, 0.0  ;;  %v931_v22 = vpop.f32.mrb[14].mxu0  ;;  %v1036_v23 = vpop.f32.mrb[14].mxu1  ;;  %v3040_v5 = vld [vmem:[%s3959_s3 + $0x68] sm:$0xff]  ;;  %v3041_v6 = vld [vmem:[%s3959_s3 + $0x70] sm:$0xff] }
 0x27c   : > { %v3198_v24 = vpack.c.bf16 %v950_v14, %v948_v8  ;;  %v3206_v25 = vpack.c.bf16 %v1055_v20, %v1053_v9  ;;  %v933_v10 = vpop.f32.mrb[15].mxu0  ;;  %v1038_v26 = vpop.f32.mrb[15].mxu1  ;;  %v932_v28 = vadd.f32 %v931_v22, %v826_v7  ;;  %v1037_v13 = vadd.f32 %v1036_v23, %v826_v7 }
 0x27d   : > { %v3196_v11 = vpack.c.bf16 %v951_v16, %v949_v21  ;;  %v3204_v27 = vpack.c.bf16 %v1056_v19, %v1054_v15  ;;  %v934_v17 = vadd.f32 %v933_v10, %v826_v7  ;;  %v1039_v29 = vadd.f32 %v1038_v26, %v826_v7  ;;  %v1078_v7 = vpop.permute.xlu1 %1077  ;;  %v1083_v21 = vpop.permute.xlu0 %1082 }
 0x27e   : > { %v952_v31 = vmax.f32 %v932_v28, 0.0  ;;  %v1057_v42 = vmax.f32 %v1037_v13, 0.0 }
 0x27f   : > { %v937_v32 = vpop.f32.mrb[16].mxu0  ;;  %v1042_v33 = vpop.f32.mrb[16].mxu1  ;;  %3197 = vmatprep.subr.bf16.mxu0 %v3196_v11  ;;  %3205 = vmatprep.subr.bf16.mxu1 %v3204_v27  ;;  %v953_v35 = vmax.f32 %v934_v17, 0.0  ;;  %v1058_v44 = vmax.f32 %v1039_v29, 0.0 }
 0x280   : > { %v938_v36 = vadd.f32 %v937_v32, %v831_v12  ;;  %v1043_v37 = vadd.f32 %v1042_v33, %v831_v12  ;;  %v939_v38 = vpop.f32.mrb[17].mxu0  ;;  %v1044_v39 = vpop.f32.mrb[17].mxu1  ;;  %3199 = vmatpush1.bf16.msra.mxu0 %v3198_v24  ;;  %3207 = vmatpush1.bf16.msra.mxu1 %v3206_v25 }
 0x281   : > { %v940_v40 = vadd.f32 %v939_v38, %v831_v12  ;;  %v1045_v41 = vadd.f32 %v1044_v39, %v831_v12  ;;  %v1088_v28 = vpop.permute.xlu1 %1087 }
 0x282   : > { %v954_v43 = vmax.f32 %v938_v36, 0.0  ;;  %v1059_v34 = vmax.f32 %v1043_v37, 0.0 }
 0x283   : > { %v955_v45 = vmax.f32 %v940_v40, 0.0  ;;  %v1060_v46 = vmax.f32 %v1045_v41, 0.0  ;;  %v943_v47 = vpop.f32.mrb[18].mxu0  ;;  %v1048_v50 = vpop.f32.mrb[18].mxu1 }
 0x284   : > { %v3202_v52 = vpack.c.bf16 %v954_v43, %v952_v31  ;;  %v3210_v54 = vpack.c.bf16 %v1059_v34, %v1057_v42  ;;  %v945_v55 = vpop.f32.mrb[19].mxu0  ;;  %v1050_v56 = vpop.f32.mrb[19].mxu1  ;;  %v944_v0 = vadd.f32 %v943_v47, %v836_v30  ;;  %v1049_v1 = vadd.f32 %v1048_v50, %v836_v30 }
 0x285   : > { %v3200_v57 = vpack.c.bf16 %v955_v45, %v953_v35  ;;  %v3208_v61 = vpack.c.bf16 %v1060_v46, %v1058_v44  ;;  %v946_v62 = vadd.f32 %v945_v55, %v836_v30  ;;  %v1051_v63 = vadd.f32 %v1050_v56, %v836_v30  ;;  %v1093_v35 = vpop.permute.xlu0 %1092 }
 0x286   : > { %v956_v58 = vmax.f32 %v944_v0, 0.0  ;;  %v1061_v60 = vmax.f32 %v1049_v1, 0.0 }
 0x287   : > { %v957_v48 = vmax.f32 %v946_v62, 0.0  ;;  %v1062_v49 = vmax.f32 %v1051_v63, 0.0  ;;  %3201 = vmatprep.subr.bf16.mxu0 %v3200_v57  ;;  %3209 = vmatprep.subr.bf16.mxu1 %v3208_v61  ;;  %v1098_v63 = vpop.permute.xlu1 %1097 }
 0x288   : > { %3203 = vmatpush1.bf16.msra.mxu0 %v3202_v52  ;;  %3211 = vmatpush1.bf16.msra.mxu1 %v3210_v54 }
 0x289   : > { %1123 = vmatprep.subr.mxu0 %v957_v48  ;;  %1228 = vmatprep.subr.mxu1 %v1062_v49 }
 0x28c   : > { %1124 = vmatpush1.msra.mxu0 %v956_v58  ;;  %1229 = vmatpush1.msra.mxu1 %v1061_v60 }
 0x28d   : > { %3047 = vmatmul.mubr.msk.f32.vlgmr.msra.gmra.mrb[20].mxu0 %vm575_vm0, %v3037_v2  ;;  %3052 = vmatmul.mubr.msk.f32.vlgmr.msra.gmra.mrb[20].mxu1 %vm575_vm0, %v3037_v2 }
 0x28e   : > { %1185 = vmatprep.mubr.f32.mxu0 %v3354_v18  ;;  %1290 = vmatprep.mubr.f32.mxu1 %v3354_v18 }
 0x291   : > { %3048 = vmatmul.mubr.msk.f32.gmra.mrb[22].mxu0 %vm575_vm0, %v3038_v3  ;;  %3053 = vmatmul.mubr.msk.f32.gmra.mrb[22].mxu1 %vm575_vm0, %v3038_v3 }
 0x292   : > { %1191 = vmatprep.mubr.f32.mxu0 %v3354_v18  ;;  %1296 = vmatprep.mubr.f32.mxu1 %v3354_v18 }
 0x295   : > { %3049 = vmatmul.mubr.msk.f32.gmra.mrb[24].mxu0 %vm575_vm0, %v3039_v4  ;;  %3054 = vmatmul.mubr.msk.f32.gmra.mrb[24].mxu1 %vm575_vm0, %v3039_v4 }
 0x296   : > { %1197 = vmatprep.mubr.f32.mxu0 %v3354_v18  ;;  %1302 = vmatprep.mubr.f32.mxu1 %v3354_v18 }
 0x299   : > { %3050 = vmatmul.mubr.msk.f32.gmra.mrb[26].mxu0 %vm575_vm0, %v3040_v5  ;;  %3055 = vmatmul.mubr.msk.f32.gmra.mrb[26].mxu1 %vm575_vm0, %v3040_v5 }
 0x29a   : > { %1203 = vmatprep.mubr.f32.mxu0 %v3354_v18  ;;  %1308 = vmatprep.mubr.f32.mxu1 %v3354_v18 }
 0x29d   : > { %3051 = vmatmul.mubr.msk.f32.gmra.mrb[28].mxu0 %vm575_vm0, %v3041_v6  ;;  %3056 = vmatmul.mubr.msk.f32.gmra.mrb[28].mxu1 %vm575_vm0, %v3041_v6 }
 0x29e   : > { %1441 = vmatprep.mubr.f32.mxu0 %v3354_v18  ;;  %1546 = vmatprep.mubr.f32.mxu1 %v3354_v18 }
 0x360   : > { %v1181_v8 = vpop.f32.mrb[20].mxu0  ;;  %v1286_v9 = vpop.f32.mrb[20].mxu1 }
 0x361   : > { %v1183_v14 = vpop.f32.mrb[21].mxu0  ;;  %v1288_v20 = vpop.f32.mrb[21].mxu1  ;;  %v1182_v15 = vadd.f32 %v1181_v8, %v1078_v7  ;;  %v1287_v16 = vadd.f32 %v1286_v9, %v1078_v7 }
 0x362   : > { %v1184_v19 = vadd.f32 %v1183_v14, %v1078_v7  ;;  %v1289_v22 = vadd.f32 %v1288_v20, %v1078_v7 }
 0x363   : > { %v1210_v13 = vmax.f32 %v1182_v15, 0.0  ;;  %v1315_v17 = vmax.f32 %v1287_v16, 0.0 }
 0x364   : > { %v1187_v23 = vpop.f32.mrb[22].mxu0  ;;  %v1292_v24 = vpop.f32.mrb[22].mxu1  ;;  %v1211_v33 = vmax.f32 %v1184_v19, 0.0  ;;  %v1316_v36 = vmax.f32 %v1289_v22, 0.0 }
 0x365   : > { %v1188_v25 = vadd.f32 %v1187_v23, %v1083_v21  ;;  %v1293_v10 = vadd.f32 %v1292_v24, %v1083_v21  ;;  %v1189_v26 = vpop.f32.mrb[23].mxu0  ;;  %v1294_v11 = vpop.f32.mrb[23].mxu1 }
 0x366   : > { %v1190_v27 = vadd.f32 %v1189_v26, %v1083_v21  ;;  %v1295_v12 = vadd.f32 %v1294_v11, %v1083_v21  ;;  %v3058_v26 = vld [vmem:[%s3959_s3 + $0x80] sm:$0xff]  ;;  %v3059_v11 = vld [vmem:[%s3959_s3 + $0x88] sm:$0xff] }
 0x367   : > { %v1212_v29 = vmax.f32 %v1188_v25, 0.0  ;;  %v1317_v32 = vmax.f32 %v1293_v10, 0.0  ;;  %v3057_v10 = vld [vmem:[%s3959_s3 + $0x78] sm:$0xff] }
 0x368   : > { %v1213_v37 = vmax.f32 %v1190_v27, 0.0  ;;  %v1318_v38 = vmax.f32 %v1295_v12, 0.0  ;;  %v1193_v39 = vpop.f32.mrb[24].mxu0  ;;  %v1298_v40 = vpop.f32.mrb[24].mxu1  ;;  %v3060_v27 = vld [vmem:[%s3959_s3 + $0x90] sm:$0xff]  ;;  %v3061_v12 = vld [vmem:[%s3959_s3 + $0x98] sm:$0xff] }
 0x369   : > { %v3214_v41 = vpack.c.bf16 %v1212_v29, %v1210_v13  ;;  %v3222_v30 = vpack.c.bf16 %v1317_v32, %v1315_v17  ;;  %v1195_v31 = vpop.f32.mrb[25].mxu0  ;;  %v1300_v42 = vpop.f32.mrb[25].mxu1  ;;  %v1194_v44 = vadd.f32 %v1193_v39, %v1088_v28  ;;  %v1299_v45 = vadd.f32 %v1298_v40, %v1088_v28 }
 0x36a   : > { %v3212_v43 = vpack.c.bf16 %v1213_v37, %v1211_v33  ;;  %v3220_v34 = vpack.c.bf16 %v1318_v38, %v1316_v36  ;;  %v1196_v46 = vadd.f32 %v1195_v31, %v1088_v28  ;;  %v1301_v47 = vadd.f32 %v1300_v42, %v1088_v28  ;;  %v1340_v28 = vpop.permute.xlu0 %1339  ;;  %v1345_v33 = vpop.permute.xlu1 %1344 }
 0x36b   : > { %v1214_v0 = vmax.f32 %v1194_v44, 0.0  ;;  %v1319_v1 = vmax.f32 %v1299_v45, 0.0 }
 0x36c   : > { %v1199_v50 = vpop.f32.mrb[26].mxu0  ;;  %v1304_v52 = vpop.f32.mrb[26].mxu1  ;;  %3213 = vmatprep.subr.bf16.mxu0 %v3212_v43  ;;  %3221 = vmatprep.subr.bf16.mxu1 %v3220_v34  ;;  %v1215_v58 = vmax.f32 %v1196_v46, 0.0  ;;  %v1320_v60 = vmax.f32 %v1301_v47, 0.0 }
 0x36d   : > { %v1200_v54 = vadd.f32 %v1199_v50, %v1093_v35  ;;  %v1305_v55 = vadd.f32 %v1304_v52, %v1093_v35  ;;  %v1201_v56 = vpop.f32.mrb[27].mxu0  ;;  %v1306_v57 = vpop.f32.mrb[27].mxu1  ;;  %3215 = vmatpush1.bf16.msra.mxu0 %v3214_v41  ;;  %3223 = vmatpush1.bf16.msra.mxu1 %v3222_v30 }
 0x36e   : > { %v1202_v61 = vadd.f32 %v1201_v56, %v1093_v35  ;;  %v1307_v62 = vadd.f32 %v1306_v57, %v1093_v35  ;;  %v1350_v44 = vpop.permute.xlu0 %1349 }
 0x36f   : > { %v1216_v48 = vmax.f32 %v1200_v54, 0.0  ;;  %v1321_v49 = vmax.f32 %v1305_v55, 0.0 }
 0x370   : > { %v1217_v2 = vmax.f32 %v1202_v61, 0.0  ;;  %v1322_v3 = vmax.f32 %v1307_v62, 0.0  ;;  %v1205_v4 = vpop.f32.mrb[28].mxu0  ;;  %v1310_v5 = vpop.f32.mrb[28].mxu1 }
 0x371   : > { %v3218_v6 = vpack.c.bf16 %v1216_v48, %v1214_v0  ;;  %v3226_v7 = vpack.c.bf16 %v1321_v49, %v1319_v1  ;;  %v1207_v8 = vpop.f32.mrb[29].mxu0  ;;  %v1312_v9 = vpop.f32.mrb[29].mxu1  ;;  %v1206_v16 = vadd.f32 %v1205_v4, %v1098_v63  ;;  %v1311_v19 = vadd.f32 %v1310_v5, %v1098_v63 }
 0x372   : > { %v3216_v14 = vpack.c.bf16 %v1217_v2, %v1215_v58  ;;  %v3224_v20 = vpack.c.bf16 %v1322_v3, %v1320_v60  ;;  %v1208_v21 = vadd.f32 %v1207_v8, %v1098_v63  ;;  %v1313_v15 = vadd.f32 %v1312_v9, %v1098_v63  ;;  %v1355_v58 = vpop.permute.xlu1 %1354 }
 0x373   : > { %v1218_v24 = vmax.f32 %v1206_v16, 0.0  ;;  %v1323_v25 = vmax.f32 %v1311_v19, 0.0 }
 0x374   : > { %v1219_v22 = vmax.f32 %v1208_v21, 0.0  ;;  %v1324_v23 = vmax.f32 %v1313_v15, 0.0  ;;  %3217 = vmatprep.subr.bf16.mxu0 %v3216_v14  ;;  %3225 = vmatprep.subr.bf16.mxu1 %v3224_v20  ;;  %v1360_v15 = vpop.permute.xlu0 %1359 }
 0x375   : > { %3219 = vmatpush1.bf16.msra.mxu0 %v3218_v6  ;;  %3227 = vmatpush1.bf16.msra.mxu1 %v3226_v7 }
 0x376   : > { %1385 = vmatprep.subr.mxu0 %v1219_v22  ;;  %1490 = vmatprep.subr.mxu1 %v1324_v23 }
 0x379   : > { %1386 = vmatpush1.msra.mxu0 %v1218_v24  ;;  %1491 = vmatpush1.msra.mxu1 %v1323_v25 }
 0x37a   : > { %3067 = vmatmul.mubr.msk.f32.vlgmr.msra.gmra.mrb[30].mxu0 %vm575_vm0, %v3057_v10  ;;  %3072 = vmatmul.mubr.msk.f32.vlgmr.msra.gmra.mrb[30].mxu1 %vm575_vm0, %v3057_v10 }
 0x37b   : > { %1447 = vmatprep.mubr.f32.mxu0 %v3354_v18  ;;  %1552 = vmatprep.mubr.f32.mxu1 %v3354_v18 }
 0x37e   : > { %3068 = vmatmul.mubr.msk.f32.gmra.mrb[32].mxu0 %vm575_vm0, %v3058_v26  ;;  %3073 = vmatmul.mubr.msk.f32.gmra.mrb[32].mxu1 %vm575_vm0, %v3058_v26 }
 0x37f   : > { %1453 = vmatprep.mubr.f32.mxu0 %v3354_v18  ;;  %1558 = vmatprep.mubr.f32.mxu1 %v3354_v18 }
 0x382   : > { %3069 = vmatmul.mubr.msk.f32.gmra.mrb[34].mxu0 %vm575_vm0, %v3059_v11  ;;  %3074 = vmatmul.mubr.msk.f32.gmra.mrb[34].mxu1 %vm575_vm0, %v3059_v11 }
 0x383   : > { %1459 = vmatprep.mubr.f32.mxu0 %v3354_v18  ;;  %1564 = vmatprep.mubr.f32.mxu1 %v3354_v18 }
 0x386   : > { %3070 = vmatmul.mubr.msk.f32.gmra.mrb[36].mxu0 %vm575_vm0, %v3060_v27  ;;  %3075 = vmatmul.mubr.msk.f32.gmra.mrb[36].mxu1 %vm575_vm0, %v3060_v27 }
 0x387   : > { %1465 = vmatprep.mubr.f32.mxu0 %v3354_v18  ;;  %1570 = vmatprep.mubr.f32.mxu1 %v3354_v18 }
 0x38a   : > { %3071 = vmatmul.mubr.msk.f32.gmra.mrb[38].mxu0 %vm575_vm0, %v3061_v12  ;;  %3076 = vmatmul.mubr.msk.f32.gmra.mrb[38].mxu1 %vm575_vm0, %v3061_v12 }
 0x38b   : > { %1703 = vmatprep.mubr.f32.mxu0 %v3354_v18  ;;  %1808 = vmatprep.mubr.f32.mxu1 %v3354_v18 }
 0x44d   : > { %v1443_v13 = vpop.f32.mrb[30].mxu0  ;;  %v1548_v17 = vpop.f32.mrb[30].mxu1 }
 0x44e   : > { %v1445_v29 = vpop.f32.mrb[31].mxu0  ;;  %v1550_v32 = vpop.f32.mrb[31].mxu1  ;;  %v1444_v36 = vadd.f32 %v1443_v13, %v1340_v28  ;;  %v1549_v37 = vadd.f32 %v1548_v17, %v1340_v28 }
 0x44f   : > { %v1446_v38 = vadd.f32 %v1445_v29, %v1340_v28  ;;  %v1551_v39 = vadd.f32 %v1550_v32, %v1340_v28 }
 0x450   : > { %v1472_v45 = vmax.f32 %v1444_v36, 0.0  ;;  %v1577_v46 = vmax.f32 %v1549_v37, 0.0 }
 0x451   : > { %v1449_v40 = vpop.f32.mrb[32].mxu0  ;;  %v1554_v41 = vpop.f32.mrb[32].mxu1  ;;  %v1473_v52 = vmax.f32 %v1446_v38, 0.0  ;;  %v1578_v54 = vmax.f32 %v1551_v39, 0.0 }
 0x452   : > { %v1450_v30 = vadd.f32 %v1449_v40, %v1345_v33  ;;  %v1555_v31 = vadd.f32 %v1554_v41, %v1345_v33  ;;  %v1451_v42 = vpop.f32.mrb[33].mxu0  ;;  %v1556_v43 = vpop.f32.mrb[33].mxu1 }
 0x453   : > { %v1452_v34 = vadd.f32 %v1451_v42, %v1345_v33  ;;  %v1557_v35 = vadd.f32 %v1556_v43, %v1345_v33  ;;  %v3078_v42 = vld [vmem:[%s3959_s3 + $0xa8] sm:$0xff]  ;;  %v3079_v43 = vld [vmem:[%s3959_s3 + $0xb0] sm:$0xff] }
 0x454   : > { %v1474_v47 = vmax.f32 %v1450_v30, 0.0  ;;  %v1579_v50 = vmax.f32 %v1555_v31, 0.0  ;;  %v3077_v31 = vld [vmem:[%s3959_s3 + $0xa0] sm:$0xff] }
 0x455   : > { %v1475_v55 = vmax.f32 %v1452_v34, 0.0  ;;  %v1580_v56 = vmax.f32 %v1557_v35, 0.0  ;;  %v1455_v57 = vpop.f32.mrb[34].mxu0  ;;  %v1560_v61 = vpop.f32.mrb[34].mxu1  ;;  %v3080_v34 = vld [vmem:[%s3959_s3 + $0xb8] sm:$0xff]  ;;  %v3081_v35 = vld [vmem:[%s3959_s3 + $0xc0] sm:$0xff] }
 0x456   : > { %v3230_v62 = vpack.c.bf16 %v1474_v47, %v1472_v45  ;;  %v3238_v63 = vpack.c.bf16 %v1579_v50, %v1577_v46  ;;  %v1457_v0 = vpop.f32.mrb[35].mxu0  ;;  %v1562_v1 = vpop.f32.mrb[35].mxu1  ;;  %v1456_v60 = vadd.f32 %v1455_v57, %v1350_v44  ;;  %v1561_v2 = vadd.f32 %v1560_v61, %v1350_v44 }
 0x457   : > { %v3228_v48 = vpack.c.bf16 %v1475_v55, %v1473_v52  ;;  %v3236_v49 = vpack.c.bf16 %v1580_v56, %v1578_v54  ;;  %v1458_v3 = vadd.f32 %v1457_v0, %v1350_v44  ;;  %v1563_v4 = vadd.f32 %v1562_v1, %v1350_v44  ;;  %v1602_v44 = vpop.permute.xlu1 %1601  ;;  %v1607_v52 = vpop.permute.xlu0 %1606 }
 0x458   : > { %v1476_v16 = vmax.f32 %v1456_v60, 0.0  ;;  %v1581_v19 = vmax.f32 %v1561_v2, 0.0 }
 0x459   : > { %v1461_v5 = vpop.f32.mrb[36].mxu0  ;;  %v1566_v6 = vpop.f32.mrb[36].mxu1  ;;  %3229 = vmatprep.subr.bf16.mxu0 %v3228_v48  ;;  %3237 = vmatprep.subr.bf16.mxu1 %v3236_v49  ;;  %v1477_v24 = vmax.f32 %v1458_v3, 0.0  ;;  %v1582_v25 = vmax.f32 %v1563_v4, 0.0 }
 0x45a   : > { %v1462_v7 = vadd.f32 %v1461_v5, %v1355_v58  ;;  %v1567_v8 = vadd.f32 %v1566_v6, %v1355_v58  ;;  %v1463_v9 = vpop.f32.mrb[37].mxu0  ;;  %v1568_v14 = vpop.f32.mrb[37].mxu1  ;;  %3231 = vmatpush1.bf16.msra.mxu0 %v3230_v62  ;;  %3239 = vmatpush1.bf16.msra.mxu1 %v3238_v63 }
 0x45b   : > { %v1464_v20 = vadd.f32 %v1463_v9, %v1355_v58  ;;  %v1569_v21 = vadd.f32 %v1568_v14, %v1355_v58  ;;  %v1612_v60 = vpop.permute.xlu1 %1611 }
 0x45c   : > { %v1478_v22 = vmax.f32 %v1462_v7, 0.0  ;;  %v1583_v23 = vmax.f32 %v1567_v8, 0.0 }
 0x45d   : > { %v1479_v10 = vmax.f32 %v1464_v20, 0.0  ;;  %v1584_v26 = vmax.f32 %v1569_v21, 0.0  ;;  %v1467_v11 = vpop.f32.mrb[38].mxu0  ;;  %v1572_v27 = vpop.f32.mrb[38].mxu1 }
 0x45e   : > { %v3234_v12 = vpack.c.bf16 %v1478_v22, %v1476_v16  ;;  %v3242_v28 = vpack.c.bf16 %v1583_v23, %v1581_v19  ;;  %v1469_v13 = vpop.f32.mrb[39].mxu0  ;;  %v1574_v17 = vpop.f32.mrb[39].mxu1  ;;  %v1468_v37 = vadd.f32 %v1467_v11, %v1360_v15  ;;  %v1573_v38 = vadd.f32 %v1572_v27, %v1360_v15 }
 0x45f   : > { %v3232_v29 = vpack.c.bf16 %v1479_v10, %v1477_v24  ;;  %v3240_v32 = vpack.c.bf16 %v1584_v26, %v1582_v25  ;;  %v1470_v33 = vadd.f32 %v1469_v13, %v1360_v15  ;;  %v1575_v36 = vadd.f32 %v1574_v17, %v1360_v15  ;;  %v1617_v24 = vpop.permute.xlu0 %1616 }
 0x460   : > { %v1480_v41 = vmax.f32 %v1468_v37, 0.0  ;;  %v1585_v30 = vmax.f32 %v1573_v38, 0.0 }
 0x461   : > { %v1481_v39 = vmax.f32 %v1470_v33, 0.0  ;;  %v1586_v40 = vmax.f32 %v1575_v36, 0.0  ;;  %3233 = vmatprep.subr.bf16.mxu0 %v3232_v29  ;;  %3241 = vmatprep.subr.bf16.mxu1 %v3240_v32  ;;  %v1622_v36 = vpop.permute.xlu1 %1621 }
 0x462   : > { %3235 = vmatpush1.bf16.msra.mxu0 %v3234_v12  ;;  %3243 = vmatpush1.bf16.msra.mxu1 %v3242_v28 }
 0x463   : > { %1647 = vmatprep.subr.mxu0 %v1481_v39  ;;  %1752 = vmatprep.subr.mxu1 %v1586_v40 }
 0x466   : > { %1648 = vmatpush1.msra.mxu0 %v1480_v41  ;;  %1753 = vmatpush1.msra.mxu1 %v1585_v30 }
 0x467   : > { %3087 = vmatmul.mubr.msk.f32.vlgmr.msra.gmra.mrb[40].mxu0 %vm575_vm0, %v3077_v31  ;;  %3092 = vmatmul.mubr.msk.f32.vlgmr.msra.gmra.mrb[40].mxu1 %vm575_vm0, %v3077_v31 }
 0x468   : > { %1709 = vmatprep.mubr.f32.mxu0 %v3354_v18  ;;  %1814 = vmatprep.mubr.f32.mxu1 %v3354_v18 }
 0x46b   : > { %3088 = vmatmul.mubr.msk.f32.gmra.mrb[42].mxu0 %vm575_vm0, %v3078_v42  ;;  %3093 = vmatmul.mubr.msk.f32.gmra.mrb[42].mxu1 %vm575_vm0, %v3078_v42 }
 0x46c   : > { %1715 = vmatprep.mubr.f32.mxu0 %v3354_v18  ;;  %1820 = vmatprep.mubr.f32.mxu1 %v3354_v18 }
 0x46f   : > { %3089 = vmatmul.mubr.msk.f32.gmra.mrb[44].mxu0 %vm575_vm0, %v3079_v43  ;;  %3094 = vmatmul.mubr.msk.f32.gmra.mrb[44].mxu1 %vm575_vm0, %v3079_v43 }
 0x470   : > { %1721 = vmatprep.mubr.f32.mxu0 %v3354_v18  ;;  %1826 = vmatprep.mubr.f32.mxu1 %v3354_v18 }
 0x473   : > { %3090 = vmatmul.mubr.msk.f32.gmra.mrb[46].mxu0 %vm575_vm0, %v3080_v34  ;;  %3095 = vmatmul.mubr.msk.f32.gmra.mrb[46].mxu1 %vm575_vm0, %v3080_v34 }
 0x474   : > { %1727 = vmatprep.mubr.f32.mxu0 %v3354_v18  ;;  %1832 = vmatprep.mubr.f32.mxu1 %v3354_v18 }
 0x477   : > { %3091 = vmatmul.mubr.msk.f32.gmra.mrb[48].mxu0 %vm575_vm0, %v3081_v35  ;;  %3096 = vmatmul.mubr.msk.f32.gmra.mrb[48].mxu1 %vm575_vm0, %v3081_v35 }
 0x478   : > { %1965 = vmatprep.mubr.f32.mxu0 %v3354_v18  ;;  %2070 = vmatprep.mubr.f32.mxu1 %v3354_v18 }
 0x53a   : > { %v1705_v45 = vpop.f32.mrb[40].mxu0  ;;  %v1810_v46 = vpop.f32.mrb[40].mxu1 }
 0x53b   : > { %v1707_v47 = vpop.f32.mrb[41].mxu0  ;;  %v1812_v50 = vpop.f32.mrb[41].mxu1  ;;  %v1706_v54 = vadd.f32 %v1705_v45, %v1602_v44  ;;  %v1811_v55 = vadd.f32 %v1810_v46, %v1602_v44 }
 0x53c   : > { %v1708_v56 = vadd.f32 %v1707_v47, %v1602_v44  ;;  %v1813_v57 = vadd.f32 %v1812_v50, %v1602_v44 }
 0x53d   : > { %v1734_v2 = vmax.f32 %v1706_v54, 0.0  ;;  %v1839_v3 = vmax.f32 %v1811_v55, 0.0 }
 0x53e   : > { %v1711_v61 = vpop.f32.mrb[42].mxu0  ;;  %v1816_v62 = vpop.f32.mrb[42].mxu1  ;;  %v1735_v6 = vmax.f32 %v1708_v56, 0.0  ;;  %v1840_v7 = vmax.f32 %v1813_v57, 0.0 }
 0x53f   : > { %v1712_v63 = vadd.f32 %v1711_v61, %v1607_v52  ;;  %v1817_v0 = vadd.f32 %v1816_v62, %v1607_v52  ;;  %v1713_v1 = vpop.f32.mrb[43].mxu0  ;;  %v1818_v48 = vpop.f32.mrb[43].mxu1 }
 0x540   : > { %v1714_v49 = vadd.f32 %v1713_v1, %v1607_v52  ;;  %v1819_v58 = vadd.f32 %v1818_v48, %v1607_v52  ;;  %v3098_v1 = vld [vmem:[%s3959_s3 + $0xd0] sm:$0xff]  ;;  %v3099_v48 = vld [vmem:[%s3959_s3 + $0xd8] sm:$0xff] }
 0x541   : > { %v1736_v4 = vmax.f32 %v1712_v63, 0.0  ;;  %v1841_v5 = vmax.f32 %v1817_v0, 0.0  ;;  %v3097_v0 = vld [vmem:[%s3959_s3 + $0xc8] sm:$0xff] }
 0x542   : > { %v1737_v8 = vmax.f32 %v1714_v49, 0.0  ;;  %v1842_v9 = vmax.f32 %v1819_v58, 0.0  ;;  %v1717_v14 = vpop.f32.mrb[44].mxu0  ;;  %v1822_v20 = vpop.f32.mrb[44].mxu1  ;;  %v3100_v49 = vld [vmem:[%s3959_s3 + $0xe0] sm:$0xff]  ;;  %v3101_v58 = vld [vmem:[%s3959_s3 + $0xe8] sm:$0xff] }
 0x543   : > { %v3246_v21 = vpack.c.bf16 %v1736_v4, %v1734_v2  ;;  %v3254_v15 = vpack.c.bf16 %v1841_v5, %v1839_v3  ;;  %v1719_v16 = vpop.f32.mrb[45].mxu0  ;;  %v1824_v19 = vpop.f32.mrb[45].mxu1  ;;  %v1718_v25 = vadd.f32 %v1717_v14, %v1612_v60  ;;  %v1823_v10 = vadd.f32 %v1822_v20, %v1612_v60 }
 0x544   : > { %v3244_v22 = vpack.c.bf16 %v1737_v8, %v1735_v6  ;;  %v3252_v23 = vpack.c.bf16 %v1842_v9, %v1840_v7  ;;  %v1720_v26 = vadd.f32 %v1719_v16, %v1612_v60  ;;  %v1825_v11 = vadd.f32 %v1824_v19, %v1612_v60  ;;  %v1864_v60 = vpop.permute.xlu0 %1863  ;;  %v1869_v6 = vpop.permute.xlu1 %1868 }
 0x545   : > { %v1738_v37 = vmax.f32 %v1718_v25, 0.0  ;;  %v1843_v38 = vmax.f32 %v1823_v10, 0.0 }
 0x546   : > { %v1723_v27 = vpop.f32.mrb[46].mxu0  ;;  %v1828_v12 = vpop.f32.mrb[46].mxu1  ;;  %3245 = vmatprep.subr.bf16.mxu0 %v3244_v22  ;;  %3253 = vmatprep.subr.bf16.mxu1 %v3252_v23  ;;  %v1739_v41 = vmax.f32 %v1720_v26, 0.0  ;;  %v1844_v30 = vmax.f32 %v1825_v11, 0.0 }
 0x547   : > { %v1724_v28 = vadd.f32 %v1723_v27, %v1617_v24  ;;  %v1829_v13 = vadd.f32 %v1828_v12, %v1617_v24  ;;  %v1725_v17 = vpop.f32.mrb[47].mxu0  ;;  %v1830_v29 = vpop.f32.mrb[47].mxu1  ;;  %3247 = vmatpush1.bf16.msra.mxu0 %v3246_v21  ;;  %3255 = vmatpush1.bf16.msra.mxu1 %v3254_v15 }
 0x548   : > { %v1726_v32 = vadd.f32 %v1725_v17, %v1617_v24  ;;  %v1831_v33 = vadd.f32 %v1830_v29, %v1617_v24  ;;  %v1874_v25 = vpop.permute.xlu0 %1873 }
 0x549   : > { %v1740_v39 = vmax.f32 %v1724_v28, 0.0  ;;  %v1845_v40 = vmax.f32 %v1829_v13, 0.0 }
 0x54a   : > { %v1741_v31 = vmax.f32 %v1726_v32, 0.0  ;;  %v1846_v42 = vmax.f32 %v1831_v33, 0.0  ;;  %v1729_v43 = vpop.f32.mrb[48].mxu0  ;;  %v1834_v34 = vpop.f32.mrb[48].mxu1 }
 0x54b   : > { %v3250_v35 = vpack.c.bf16 %v1740_v39, %v1738_v37  ;;  %v3258_v44 = vpack.c.bf16 %v1845_v40, %v1843_v38  ;;  %v1731_v45 = vpop.f32.mrb[49].mxu0  ;;  %v1836_v46 = vpop.f32.mrb[49].mxu1  ;;  %v1730_v55 = vadd.f32 %v1729_v43, %v1622_v36  ;;  %v1835_v56 = vadd.f32 %v1834_v34, %v1622_v36 }
 0x54c   : > { %v3248_v47 = vpack.c.bf16 %v1741_v31, %v1739_v41  ;;  %v3256_v50 = vpack.c.bf16 %v1846_v42, %v1844_v30  ;;  %v1732_v52 = vadd.f32 %v1731_v45, %v1622_v36  ;;  %v1837_v54 = vadd.f32 %v1836_v46, %v1622_v36  ;;  %v1879_v41 = vpop.permute.xlu1 %1878 }
 0x54d   : > { %v1742_v62 = vmax.f32 %v1730_v55, 0.0  ;;  %v1847_v63 = vmax.f32 %v1835_v56, 0.0 }
 0x54e   : > { %v1743_v57 = vmax.f32 %v1732_v52, 0.0  ;;  %v1848_v61 = vmax.f32 %v1837_v54, 0.0  ;;  %3249 = vmatprep.subr.bf16.mxu0 %v3248_v47  ;;  %3257 = vmatprep.subr.bf16.mxu1 %v3256_v50  ;;  %v1884_v54 = vpop.permute.xlu0 %1883 }
 0x54f   : > { %3251 = vmatpush1.bf16.msra.mxu0 %v3250_v35  ;;  %3259 = vmatpush1.bf16.msra.mxu1 %v3258_v44 }
 0x550   : > { %1909 = vmatprep.subr.mxu0 %v1743_v57  ;;  %2014 = vmatprep.subr.mxu1 %v1848_v61 }
 0x553   : > { %1910 = vmatpush1.msra.mxu0 %v1742_v62  ;;  %2015 = vmatpush1.msra.mxu1 %v1847_v63 }
 0x554   : > { %3107 = vmatmul.mubr.msk.f32.vlgmr.msra.gmra.mrb[50].mxu0 %vm575_vm0, %v3097_v0  ;;  %3112 = vmatmul.mubr.msk.f32.vlgmr.msra.gmra.mrb[50].mxu1 %vm575_vm0, %v3097_v0 }
 0x555   : > { %1971 = vmatprep.mubr.f32.mxu0 %v3354_v18  ;;  %2076 = vmatprep.mubr.f32.mxu1 %v3354_v18 }
 0x558   : > { %3108 = vmatmul.mubr.msk.f32.gmra.mrb[52].mxu0 %vm575_vm0, %v3098_v1  ;;  %3113 = vmatmul.mubr.msk.f32.gmra.mrb[52].mxu1 %vm575_vm0, %v3098_v1 }
 0x559   : > { %1977 = vmatprep.mubr.f32.mxu0 %v3354_v18  ;;  %2082 = vmatprep.mubr.f32.mxu1 %v3354_v18 }
 0x55c   : > { %3109 = vmatmul.mubr.msk.f32.gmra.mrb[54].mxu0 %vm575_vm0, %v3099_v48  ;;  %3114 = vmatmul.mubr.msk.f32.gmra.mrb[54].mxu1 %vm575_vm0, %v3099_v48 }
 0x55d   : > { %1983 = vmatprep.mubr.f32.mxu0 %v3354_v18  ;;  %2088 = vmatprep.mubr.f32.mxu1 %v3354_v18 }
 0x560   : > { %3110 = vmatmul.mubr.msk.f32.gmra.mrb[56].mxu0 %vm575_vm0, %v3100_v49  ;;  %3115 = vmatmul.mubr.msk.f32.gmra.mrb[56].mxu1 %vm575_vm0, %v3100_v49 }
 0x561   : > { %1989 = vmatprep.mubr.f32.mxu0 %v3354_v18  ;;  %2094 = vmatprep.mubr.f32.mxu1 %v3354_v18 }
 0x564   : > { %3111 = vmatmul.mubr.msk.f32.gmra.mrb[58].mxu0 %vm575_vm0, %v3101_v58  ;;  %3116 = vmatmul.mubr.msk.f32.gmra.mrb[58].mxu1 %vm575_vm0, %v3101_v58 }
 0x565   : > { %2227 = vmatprep.mubr.f32.mxu0 %v3354_v18  ;;  %2332 = vmatprep.mubr.f32.mxu1 %v3354_v18 }
 0x627   : > { %v1967_v2 = vpop.f32.mrb[50].mxu0  ;;  %v2072_v3 = vpop.f32.mrb[50].mxu1 }
 0x628   : > { %v1969_v4 = vpop.f32.mrb[51].mxu0  ;;  %v2074_v5 = vpop.f32.mrb[51].mxu1  ;;  %v1968_v7 = vadd.f32 %v1967_v2, %v1864_v60  ;;  %v2073_v8 = vadd.f32 %v2072_v3, %v1864_v60 }
 0x629   : > { %v1970_v9 = vadd.f32 %v1969_v4, %v1864_v60  ;;  %v2075_v14 = vadd.f32 %v2074_v5, %v1864_v60 }
 0x62a   : > { %v1996_v10 = vmax.f32 %v1968_v7, 0.0  ;;  %v2101_v26 = vmax.f32 %v2073_v8, 0.0 }
 0x62b   : > { %v1973_v20 = vpop.f32.mrb[52].mxu0  ;;  %v2078_v21 = vpop.f32.mrb[52].mxu1  ;;  %v1997_v12 = vmax.f32 %v1970_v9, 0.0  ;;  %v2102_v28 = vmax.f32 %v2075_v14, 0.0 }
 0x62c   : > { %v1974_v15 = vadd.f32 %v1973_v20, %v1869_v6  ;;  %v2079_v16 = vadd.f32 %v2078_v21, %v1869_v6  ;;  %v1975_v19 = vpop.f32.mrb[53].mxu0  ;;  %v2080_v22 = vpop.f32.mrb[53].mxu1 }
 0x62d   : > { %v1976_v23 = vadd.f32 %v1975_v19, %v1869_v6  ;;  %v2081_v24 = vadd.f32 %v2080_v22, %v1869_v6  ;;  %v3118_v19 = vld [vmem:[%s3959_s3 + $0xf8] sm:$0xff]  ;;  %v3119_v22 = vld [vmem:[%s3959_s3 + $0x100] sm:$0xff] }
 0x62e   : > { %v1998_v11 = vmax.f32 %v1974_v15, 0.0  ;;  %v2103_v27 = vmax.f32 %v2079_v16, 0.0  ;;  %v3117_v16 = vld [vmem:[%s3959_s3 + $0xf0] sm:$0xff] }
 0x62f   : > { %v1999_v13 = vmax.f32 %v1976_v23, 0.0  ;;  %v2104_v17 = vmax.f32 %v2081_v24, 0.0  ;;  %v1979_v29 = vpop.f32.mrb[54].mxu0  ;;  %v2084_v32 = vpop.f32.mrb[54].mxu1  ;;  %v3120_v23 = vld [vmem:[%s3959_s3 + $0x108] sm:$0xff]  ;;  %v3121_v24 = vld [vmem:[%s3959_s3 + $0x110] sm:$0xff] }
 0x630   : > { %v3262_v33 = vpack.c.bf16 %v1998_v11, %v1996_v10  ;;  %v3270_v36 = vpack.c.bf16 %v2103_v27, %v2101_v26  ;;  %v1981_v37 = vpop.f32.mrb[55].mxu0  ;;  %v2086_v38 = vpop.f32.mrb[55].mxu1  ;;  %v1980_v30 = vadd.f32 %v1979_v29, %v1874_v25  ;;  %v2085_v31 = vadd.f32 %v2084_v32, %v1874_v25 }
 0x631   : > { %v3260_v39 = vpack.c.bf16 %v1999_v13, %v1997_v12  ;;  %v3268_v40 = vpack.c.bf16 %v2104_v17, %v2102_v28  ;;  %v1982_v42 = vadd.f32 %v1981_v37, %v1874_v25  ;;  %v2087_v43 = vadd.f32 %v2086_v38, %v1874_v25  ;;  %v2126_v25 = vpop.permute.xlu1 %2125  ;;  %v2131_v12 = vpop.permute.xlu0 %2130 }
 0x632   : > { %v2000_v55 = vmax.f32 %v1980_v30, 0.0  ;;  %v2105_v56 = vmax.f32 %v2085_v31, 0.0 }
 0x633   : > { %v1985_v34 = vpop.f32.mrb[56].mxu0  ;;  %v2090_v35 = vpop.f32.mrb[56].mxu1  ;;  %3261 = vmatprep.subr.bf16.mxu0 %v3260_v39  ;;  %3269 = vmatprep.subr.bf16.mxu1 %v3268_v40  ;;  %v2001_v62 = vmax.f32 %v1982_v42, 0.0  ;;  %v2106_v63 = vmax.f32 %v2087_v43, 0.0 }
 0x634   : > { %v1986_v44 = vadd.f32 %v1985_v34, %v1879_v41  ;;  %v2091_v45 = vadd.f32 %v2090_v35, %v1879_v41  ;;  %v1987_v46 = vpop.f32.mrb[57].mxu0  ;;  %v2092_v47 = vpop.f32.mrb[57].mxu1  ;;  %3263 = vmatpush1.bf16.msra.mxu0 %v3262_v33  ;;  %3271 = vmatpush1.bf16.msra.mxu1 %v3270_v36 }
 0x635   : > { %v1988_v50 = vadd.f32 %v1987_v46, %v1879_v41  ;;  %v2093_v52 = vadd.f32 %v2092_v47, %v1879_v41  ;;  %v2136_v30 = vpop.permute.xlu1 %2135 }
 0x636   : > { %v2002_v57 = vmax.f32 %v1986_v44, 0.0  ;;  %v2107_v61 = vmax.f32 %v2091_v45, 0.0 }
 0x637   : > { %v2003_v0 = vmax.f32 %v1988_v50, 0.0  ;;  %v2108_v1 = vmax.f32 %v2093_v52, 0.0  ;;  %v1991_v48 = vpop.f32.mrb[58].mxu0  ;;  %v2096_v49 = vpop.f32.mrb[58].mxu1 }
 0x638   : > { %v3266_v58 = vpack.c.bf16 %v2002_v57, %v2000_v55  ;;  %v3274_v60 = vpack.c.bf16 %v2107_v61, %v2105_v56  ;;  %v1993_v2 = vpop.f32.mrb[59].mxu0  ;;  %v2098_v3 = vpop.f32.mrb[59].mxu1  ;;  %v1992_v8 = vadd.f32 %v1991_v48, %v1884_v54  ;;  %v2097_v9 = vadd.f32 %v2096_v49, %v1884_v54 }
 0x639   : > { %v3264_v4 = vpack.c.bf16 %v2003_v0, %v2001_v62  ;;  %v3272_v5 = vpack.c.bf16 %v2108_v1, %v2106_v63  ;;  %v1994_v6 = vadd.f32 %v1993_v2, %v1884_v54  ;;  %v2099_v7 = vadd.f32 %v2098_v3, %v1884_v54  ;;  %v2141_v62 = vpop.permute.xlu0 %2140 }
 0x63a   : > { %v2004_v21 = vmax.f32 %v1992_v8, 0.0  ;;  %v2109_v15 = vmax.f32 %v2097_v9, 0.0 }
 0x63b   : > { %v2005_v14 = vmax.f32 %v1994_v6, 0.0  ;;  %v2110_v20 = vmax.f32 %v2099_v7, 0.0  ;;  %3265 = vmatprep.subr.bf16.mxu0 %v3264_v4  ;;  %3273 = vmatprep.subr.bf16.mxu1 %v3272_v5  ;;  %v2146_v7 = vpop.permute.xlu1 %2145 }
 0x63c   : > { %3267 = vmatpush1.bf16.msra.mxu0 %v3266_v58  ;;  %3275 = vmatpush1.bf16.msra.mxu1 %v3274_v60 }
 0x63d   : > { %2171 = vmatprep.subr.mxu0 %v2005_v14  ;;  %2276 = vmatprep.subr.mxu1 %v2110_v20 }
 0x640   : > { %2172 = vmatpush1.msra.mxu0 %v2004_v21  ;;  %2277 = vmatpush1.msra.mxu1 %v2109_v15 }
 0x641   : > { %3127 = vmatmul.mubr.msk.f32.vlgmr.msra.gmra.mrb[60].mxu0 %vm575_vm0, %v3117_v16  ;;  %3132 = vmatmul.mubr.msk.f32.vlgmr.msra.gmra.mrb[60].mxu1 %vm575_vm0, %v3117_v16 }
 0x642   : > { %2233 = vmatprep.mubr.f32.mxu0 %v3354_v18  ;;  %2338 = vmatprep.mubr.f32.mxu1 %v3354_v18 }
 0x645   : > { %3128 = vmatmul.mubr.msk.f32.gmra.mrb[62].mxu0 %vm575_vm0, %v3118_v19  ;;  %3133 = vmatmul.mubr.msk.f32.gmra.mrb[62].mxu1 %vm575_vm0, %v3118_v19 }
 0x646   : > { %2239 = vmatprep.mubr.f32.mxu0 %v3354_v18  ;;  %2344 = vmatprep.mubr.f32.mxu1 %v3354_v18 }
 0x649   : > { %3129 = vmatmul.mubr.msk.f32.gmra.mrb[64].mxu0 %vm575_vm0, %v3119_v22  ;;  %3134 = vmatmul.mubr.msk.f32.gmra.mrb[64].mxu1 %vm575_vm0, %v3119_v22 }
 0x64a   : > { %2245 = vmatprep.mubr.f32.mxu0 %v3354_v18  ;;  %2350 = vmatprep.mubr.f32.mxu1 %v3354_v18 }
 0x64d   : > { %3130 = vmatmul.mubr.msk.f32.gmra.mrb[66].mxu0 %vm575_vm0, %v3120_v23  ;;  %3135 = vmatmul.mubr.msk.f32.gmra.mrb[66].mxu1 %vm575_vm0, %v3120_v23 }
 0x64e   : > { %2251 = vmatprep.mubr.f32.mxu0 %v3354_v18  ;;  %2356 = vmatprep.mubr.f32.mxu1 %v3354_v18 }
 0x651   : > { %3131 = vmatmul.mubr.msk.f32.gmra.mrb[68].mxu0 %vm575_vm0, %v3121_v24  ;;  %3136 = vmatmul.mubr.msk.f32.gmra.mrb[68].mxu1 %vm575_vm0, %v3121_v24 }
 0x652   : > { %2489 = vmatprep.mubr.f32.mxu0 %v3354_v18  ;;  %2594 = vmatprep.mubr.f32.mxu1 %v3354_v18 }
 0x714   : > { %v2229_v10 = vpop.f32.mrb[60].mxu0  ;;  %v2334_v26 = vpop.f32.mrb[60].mxu1 }
 0x715   : > { %v2231_v11 = vpop.f32.mrb[61].mxu0  ;;  %v2336_v27 = vpop.f32.mrb[61].mxu1  ;;  %v2230_v28 = vadd.f32 %v2229_v10, %v2126_v25  ;;  %v2335_v13 = vadd.f32 %v2334_v26, %v2126_v25 }
 0x716   : > { %v2232_v17 = vadd.f32 %v2231_v11, %v2126_v25  ;;  %v2337_v29 = vadd.f32 %v2336_v27, %v2126_v25 }
 0x717   : > { %v2258_v31 = vmax.f32 %v2230_v28, 0.0  ;;  %v2363_v42 = vmax.f32 %v2335_v13, 0.0 }
 0x718   : > { %v2235_v32 = vpop.f32.mrb[62].mxu0  ;;  %v2340_v33 = vpop.f32.mrb[62].mxu1  ;;  %v2259_v35 = vmax.f32 %v2232_v17, 0.0  ;;  %v2364_v44 = vmax.f32 %v2337_v29, 0.0 }
 0x719   : > { %v2236_v36 = vadd.f32 %v2235_v32, %v2131_v12  ;;  %v2341_v37 = vadd.f32 %v2340_v33, %v2131_v12  ;;  %v2237_v38 = vpop.f32.mrb[63].mxu0  ;;  %v2342_v39 = vpop.f32.mrb[63].mxu1 }
 0x71a   : > { %v2238_v40 = vadd.f32 %v2237_v38, %v2131_v12  ;;  %v2343_v41 = vadd.f32 %v2342_v39, %v2131_v12  ;;  %v3138_v38 = vld [vmem:[%s3959_s3 + $0x120] sm:$0xff]  ;;  %v3139_v39 = vld [vmem:[%s3959_s3 + $0x128] sm:$0xff] }
 0x71b   : > { %v2260_v43 = vmax.f32 %v2236_v36, 0.0  ;;  %v2365_v34 = vmax.f32 %v2341_v37, 0.0  ;;  %v3137_v37 = vld [vmem:[%s3959_s3 + $0x118] sm:$0xff] }
 0x71c   : > { %v2261_v45 = vmax.f32 %v2238_v40, 0.0  ;;  %v2366_v46 = vmax.f32 %v2343_v41, 0.0  ;;  %v2241_v47 = vpop.f32.mrb[64].mxu0  ;;  %v2346_v50 = vpop.f32.mrb[64].mxu1  ;;  %v3140_v40 = vld [vmem:[%s3959_s3 + $0x130] sm:$0xff]  ;;  %v3141_v41 = vld [vmem:[%s3959_s3 + $0x138] sm:$0xff] }
 0x71d   : > { %v3278_v52 = vpack.c.bf16 %v2260_v43, %v2258_v31  ;;  %v3286_v54 = vpack.c.bf16 %v2365_v34, %v2363_v42  ;;  %v2243_v55 = vpop.f32.mrb[65].mxu0  ;;  %v2348_v56 = vpop.f32.mrb[65].mxu1  ;;  %v2242_v63 = vadd.f32 %v2241_v47, %v2136_v30  ;;  %v2347_v0 = vadd.f32 %v2346_v50, %v2136_v30 }
 0x71e   : > { %v3276_v57 = vpack.c.bf16 %v2261_v45, %v2259_v35  ;;  %v3284_v61 = vpack.c.bf16 %v2366_v46, %v2364_v44  ;;  %v2244_v1 = vadd.f32 %v2243_v55, %v2136_v30  ;;  %v2349_v48 = vadd.f32 %v2348_v56, %v2136_v30  ;;  %v2388_v30 = vpop.permute.xlu0 %2387  ;;  %v2393_v35 = vpop.permute.xlu1 %2392 }
 0x71f   : > { %v2262_v8 = vmax.f32 %v2242_v63, 0.0  ;;  %v2367_v9 = vmax.f32 %v2347_v0, 0.0 }
 0x720   : > { %v2247_v49 = vpop.f32.mrb[66].mxu0  ;;  %v2352_v58 = vpop.f32.mrb[66].mxu1  ;;  %3277 = vmatprep.subr.bf16.mxu0 %v3276_v57  ;;  %3285 = vmatprep.subr.bf16.mxu1 %v3284_v61  ;;  %v2263_v21 = vmax.f32 %v2244_v1, 0.0  ;;  %v2368_v15 = vmax.f32 %v2349_v48, 0.0 }
 0x721   : > { %v2248_v60 = vadd.f32 %v2247_v49, %v2141_v62  ;;  %v2353_v2 = vadd.f32 %v2352_v58, %v2141_v62  ;;  %v2249_v3 = vpop.f32.mrb[67].mxu0  ;;  %v2354_v4 = vpop.f32.mrb[67].mxu1  ;;  %3279 = vmatpush1.bf16.msra.mxu0 %v3278_v52  ;;  %3287 = vmatpush1.bf16.msra.mxu1 %v3286_v54 }
 0x722   : > { %v2250_v5 = vadd.f32 %v2249_v3, %v2141_v62  ;;  %v2355_v6 = vadd.f32 %v2354_v4, %v2141_v62  ;;  %v2398_v63 = vpop.permute.xlu0 %2397 }
 0x723   : > { %v2264_v14 = vmax.f32 %v2248_v60, 0.0  ;;  %v2369_v20 = vmax.f32 %v2353_v2, 0.0 }
 0x724   : > { %v2265_v16 = vmax.f32 %v2250_v5, 0.0  ;;  %v2370_v19 = vmax.f32 %v2355_v6, 0.0  ;;  %v2253_v22 = vpop.f32.mrb[68].mxu0  ;;  %v2358_v23 = vpop.f32.mrb[68].mxu1 }
 0x725   : > { %v3282_v24 = vpack.c.bf16 %v2264_v14, %v2262_v8  ;;  %v3290_v25 = vpack.c.bf16 %v2369_v20, %v2367_v9  ;;  %v2255_v10 = vpop.f32.mrb[69].mxu0  ;;  %v2360_v26 = vpop.f32.mrb[69].mxu1  ;;  %v2254_v13 = vadd.f32 %v2253_v22, %v2146_v7  ;;  %v2359_v17 = vadd.f32 %v2358_v23, %v2146_v7 }
 0x726   : > { %v3280_v11 = vpack.c.bf16 %v2265_v16, %v2263_v21  ;;  %v3288_v27 = vpack.c.bf16 %v2370_v19, %v2368_v15  ;;  %v2256_v12 = vadd.f32 %v2255_v10, %v2146_v7  ;;  %v2361_v28 = vadd.f32 %v2360_v26, %v2146_v7  ;;  %v2403_v20 = vpop.permute.xlu1 %2402 }
 0x727   : > { %v2266_v33 = vmax.f32 %v2254_v13, 0.0  ;;  %v2371_v36 = vmax.f32 %v2359_v17, 0.0 }
 0x728   : > { %v2267_v29 = vmax.f32 %v2256_v12, 0.0  ;;  %v2372_v32 = vmax.f32 %v2361_v28, 0.0  ;;  %3281 = vmatprep.subr.bf16.mxu0 %v3280_v11  ;;  %3289 = vmatprep.subr.bf16.mxu1 %v3288_v27  ;;  %v2408_v12 = vpop.permute.xlu0 %2407 }
 0x729   : > { %3283 = vmatpush1.bf16.msra.mxu0 %v3282_v24  ;;  %3291 = vmatpush1.bf16.msra.mxu1 %v3290_v25 }
 0x72a   : > { %2433 = vmatprep.subr.mxu0 %v2267_v29  ;;  %2538 = vmatprep.subr.mxu1 %v2372_v32 }
 0x72d   : > { %2434 = vmatpush1.msra.mxu0 %v2266_v33  ;;  %2539 = vmatpush1.msra.mxu1 %v2371_v36 }
 0x72e   : > { %3147 = vmatmul.mubr.msk.f32.vlgmr.msra.gmra.mrb[70].mxu0 %vm575_vm0, %v3137_v37  ;;  %3152 = vmatmul.mubr.msk.f32.vlgmr.msra.gmra.mrb[70].mxu1 %vm575_vm0, %v3137_v37 }
 0x72f   : > { %2495 = vmatprep.mubr.f32.mxu0 %v3354_v18  ;;  %2600 = vmatprep.mubr.f32.mxu1 %v3354_v18 }
 0x732   : > { %3148 = vmatmul.mubr.msk.f32.gmra.mrb[72].mxu0 %vm575_vm0, %v3138_v38  ;;  %3153 = vmatmul.mubr.msk.f32.gmra.mrb[72].mxu1 %vm575_vm0, %v3138_v38 }
 0x733   : > { %2501 = vmatprep.mubr.f32.mxu0 %v3354_v18  ;;  %2606 = vmatprep.mubr.f32.mxu1 %v3354_v18 }
 0x736   : > { %3149 = vmatmul.mubr.msk.f32.gmra.mrb[74].mxu0 %vm575_vm0, %v3139_v39  ;;  %3154 = vmatmul.mubr.msk.f32.gmra.mrb[74].mxu1 %vm575_vm0, %v3139_v39 }
 0x737   : > { %2507 = vmatprep.mubr.f32.mxu0 %v3354_v18  ;;  %2612 = vmatprep.mubr.f32.mxu1 %v3354_v18 }
 0x73a   : > { %3150 = vmatmul.mubr.msk.f32.gmra.mrb[76].mxu0 %vm575_vm0, %v3140_v40  ;;  %3155 = vmatmul.mubr.msk.f32.gmra.mrb[76].mxu1 %vm575_vm0, %v3140_v40 }
 0x73b   : > { %2513 = vmatprep.mubr.f32.mxu0 %v3354_v18  ;;  %2618 = vmatprep.mubr.f32.mxu1 %v3354_v18 }
 0x73e   : > { %3151 = vmatmul.mubr.msk.f32.gmra.mrb[78].mxu0 %vm575_vm0, %v3141_v41  ;;  %3156 = vmatmul.mubr.msk.f32.gmra.mrb[78].mxu1 %vm575_vm0, %v3141_v41 }
 0x73f   : > { %2713 = vmatprep.mubr.f32.mxu0 %v3354_v18  ;;  %2784 = vmatprep.mubr.f32.mxu1 %v3354_v18 }
 0x801   : > { %v2491_v31 = vpop.f32.mrb[70].mxu0  ;;  %v2596_v42 = vpop.f32.mrb[70].mxu1 }
 0x802   : > { %v2493_v43 = vpop.f32.mrb[71].mxu0  ;;  %v2598_v34 = vpop.f32.mrb[71].mxu1  ;;  %v2492_v44 = vadd.f32 %v2491_v31, %v2388_v30  ;;  %v2597_v45 = vadd.f32 %v2596_v42, %v2388_v30 }
 0x803   : > { %v2494_v46 = vadd.f32 %v2493_v43, %v2388_v30  ;;  %v2599_v47 = vadd.f32 %v2598_v34, %v2388_v30 }
 0x804   : > { %v2520_v18 = vmax.f32 %v2492_v44, 0.0  ;;  %v2625_v0 = vmax.f32 %v2597_v45, 0.0 }
 0x805   : > { %v2497_v50 = vpop.f32.mrb[72].mxu0  ;;  %v2602_v52 = vpop.f32.mrb[72].mxu1  ;;  %v2521_v49 = vmax.f32 %v2494_v46, 0.0  ;;  %v2626_v58 = vmax.f32 %v2599_v47, 0.0 }
 0x806   : > { %v2498_v54 = vadd.f32 %v2497_v50, %v2393_v35  ;;  %v2603_v55 = vadd.f32 %v2602_v52, %v2393_v35  ;;  %v2499_v56 = vpop.f32.mrb[73].mxu0  ;;  %v2604_v57 = vpop.f32.mrb[73].mxu1 }
 0x807   : > { %v2500_v61 = vadd.f32 %v2499_v56, %v2393_v35  ;;  %v2605_v62 = vadd.f32 %v2604_v57, %v2393_v35 }
 0x808   : > { %v2522_v1 = vmax.f32 %v2498_v54, 0.0  ;;  %v2627_v48 = vmax.f32 %v2603_v55, 0.0  ;;  %v2635_v54 = vld [vmem:[%s3961_s5] sm:$0x1]  ;;  %v2640_v55 = vpop.permute.xlu1 %2639 }
 0x809   : > { %v2523_v60 = vmax.f32 %v2500_v61, 0.0  ;;  %v2628_v2 = vmax.f32 %v2605_v62, 0.0  ;;  %v2503_v3 = vpop.f32.mrb[74].mxu0  ;;  %v2608_v4 = vpop.f32.mrb[74].mxu1  ;;  %v2645_v56 = vrot.slane %v2640_v55, %v3572_v59 }
 0x80a   : > { %v3294_v5 = vpack.c.bf16 %v2522_v1, %v2520_v18  ;;  %v3302_v6 = vpack.c.bf16 %v2627_v48, %v2625_v0  ;;  %v2505_v7 = vpop.f32.mrb[75].mxu0  ;;  %v2610_v8 = vpop.f32.mrb[75].mxu1  ;;  %v2504_v21 = vadd.f32 %v2503_v3, %v2398_v63  ;;  %v2609_v15 = vadd.f32 %v2608_v4, %v2398_v63 }
 0x80b   : > { %v3292_v9 = vpack.c.bf16 %v2523_v60, %v2521_v49  ;;  %v3300_v14 = vpack.c.bf16 %v2628_v2, %v2626_v58  ;;  %v2506_v16 = vadd.f32 %v2505_v7, %v2398_v63  ;;  %v2611_v19 = vadd.f32 %v2610_v8, %v2398_v63 }
 0x80c   : > { %v2524_v28 = vmax.f32 %v2504_v21, 0.0  ;;  %v2629_v13 = vmax.f32 %v2609_v15, 0.0 }
 0x80d   : > { %v2509_v22 = vpop.f32.mrb[76].mxu0  ;;  %v2614_v23 = vpop.f32.mrb[76].mxu1  ;;  %3293 = vmatprep.subr.bf16.mxu0 %v3292_v9  ;;  %3301 = vmatprep.subr.bf16.mxu1 %v3300_v14  ;;  %v2525_v32 = vmax.f32 %v2506_v16, 0.0  ;;  %v2630_v33 = vmax.f32 %v2611_v19, 0.0 }
 0x80e   : > { %v2510_v24 = vadd.f32 %v2509_v22, %v2403_v20  ;;  %v2615_v25 = vadd.f32 %v2614_v23, %v2403_v20  ;;  %v2511_v10 = vpop.f32.mrb[77].mxu0  ;;  %v2616_v26 = vpop.f32.mrb[77].mxu1  ;;  %3295 = vmatpush1.bf16.msra.mxu0 %v3294_v5  ;;  %3303 = vmatpush1.bf16.msra.mxu1 %v3302_v6 }
 0x80f   : > { %v2512_v11 = vadd.f32 %v2511_v10, %v2403_v20  ;;  %v2617_v27 = vadd.f32 %v2616_v26, %v2403_v20  ;;  %v3355_v26 = vmov 1966171168  }
 0x810   : > { %v2526_v17 = vmax.f32 %v2510_v24, 0.0  ;;  %v2631_v29 = vmax.f32 %v2615_v25, 0.0 }
 0x811   : > { %v2527_v36 = vmax.f32 %v2512_v11, 0.0  ;;  %v2632_v37 = vmax.f32 %v2617_v27, 0.0  ;;  %v2515_v38 = vpop.f32.mrb[78].mxu0  ;;  %v2620_v39 = vpop.f32.mrb[78].mxu1  ;;  %v2857_v11 = vunpack.c.l.s4 %v3355_v26 }
 0x812   : > { %v3298_v40 = vpack.c.bf16 %v2526_v17, %v2524_v28  ;;  %v3306_v41 = vpack.c.bf16 %v2631_v29, %v2629_v13  ;;  %v2517_v30 = vpop.f32.mrb[79].mxu0  ;;  %v2622_v31 = vpop.f32.mrb[79].mxu1  ;;  %v2516_v44 = vadd.f32 %v2515_v38, %v2408_v12  ;;  %v2621_v45 = vadd.f32 %v2620_v39, %v2408_v12 }
 0x813   : > { %v3296_v42 = vpack.c.bf16 %v2527_v36, %v2525_v32  ;;  %v3304_v43 = vpack.c.bf16 %v2632_v37, %v2630_v33  ;;  %v2518_v34 = vadd.f32 %v2517_v30, %v2408_v12  ;;  %v2623_v35 = vadd.f32 %v2622_v31, %v2408_v12 }
 0x814   : > { %v2528_v50 = vmax.f32 %v2516_v44, 0.0  ;;  %v2633_v52 = vmax.f32 %v2621_v45, 0.0  ;;  %v2858_v38 = vunpack.c.0.s8 %v2857_v11 }
 0x815   : > { %v2529_v46 = vmax.f32 %v2518_v34, 0.0  ;;  %v2634_v47 = vmax.f32 %v2623_v35, 0.0  ;;  %3297 = vmatprep.subr.bf16.mxu0 %v3296_v42  ;;  %3305 = vmatprep.subr.bf16.mxu1 %v3304_v43 }
 0x816   : > { %3299 = vmatpush1.bf16.msra.mxu0 %v3298_v40  ;;  %3307 = vmatpush1.bf16.msra.mxu1 %v3306_v41 }
 0x817   : > { %2657 = vmatprep.subr.mxu0 %v2529_v46  ;;  %2728 = vmatprep.subr.mxu1 %v2634_v47 }
 0x81a   : > { %2658 = vmatpush1.msra.mxu0 %v2528_v50  ;;  %2729 = vmatpush1.msra.mxu1 %v2633_v52 }
 0x81b   : > { %3157 = vmatmul.mubr.msk.f32.vlgmr.msra.gmra.mrb[80].mxu0 %vm575_vm0, %v2635_v54  ;;  %3158 = vmatmul.mubr.msk.f32.vlgmr.msra.gmra.mrb[80].mxu1 %vm575_vm0, %v2635_v54 }
 0x8ee   : > { %v2715_v57 = vpop.f32.mrb[80].mxu0  ;;  %v2786_v61 = vpop.f32.mrb[80].mxu1 }
 0x8ef   : > { %v3926_v62 = vadd.f32 %v2715_v57, %v2645_v56  ;;  %v3928_v63 = vadd.f32 %v2786_v61, %v2645_v56  ;;  %v2717_v18 = vpop.f32.mrb[81].mxu0  ;;  %v2788_v0 = vpop.f32.mrb[81].mxu1 }
 0x8f0   : > { %v3930_v1 = vadd.f32 %v2717_v18, %v2645_v56  ;;  %v3932_v48 = vadd.f32 %v2788_v0, %v2645_v56 }
 0x8f1   : > { %v2793_v49 = vand.u32 2147483647, %v3926_v62  ;;  %v2823_v58 = vand.u32 2147483647, %v3928_v63  ;;  %v2791_v33 = vmax.f32 %v3926_v62, 0.0  ;;  %v2821_v36 = vmax.f32 %v3928_v63, 0.0 }
 0x8f2   : > { %v2794_v60 = vand.u32 2147483647, %v3930_v1  ;;  %v2824_v59 = vand.u32 2147483647, %v3932_v48  ;;  %v2792_v30 = vmax.f32 %v3930_v1, 0.0  ;;  %v2822_v54 = vmax.f32 %v3932_v48, 0.0 }
 0x8f3   : > { %v2795_v2 = vsub.f32 0.0, %v2793_v49  ;;  %v2825_v3 = vsub.f32 0.0, %v2823_v58 }
 0x8f4   : > { %v2796_v4 = vsub.f32 0.0, %v2794_v60  ;;  %v2826_v5 = vsub.f32 0.0, %v2824_v59  ;;  %v2861_v60 = vsub.s32 %v2858_v38, %v3559_v53 }
 0x8f5   : > { %v2797_v6 = vmul.f32 1.442695, %v2795_v2  ;;  %v2827_v7 = vmul.f32 1.442695, %v2825_v3 }
 0x8f6   : > { %v2799_v8 = vmul.f32 1.442695, %v2796_v4  ;;  %v2829_v9 = vmul.f32 1.442695, %v2826_v5 }
 0x8f7   : > { %3328 = vpow2.f32 %v2797_v6 }
 0x8f8   : > { %3330 = vpow2.f32 %v2827_v7 }
 0x8f9   : > { %3332 = vpow2.f32 %v2799_v8 }
 0x8fa   : > { %3334 = vpow2.f32 %v2829_v9 }
 0x901   : > { %v3329_v14 = vpop.eup %3328 }
 0x902   : > { %v3331_v20 = vpop.eup %3330  ;;  %v2801_v21 = vadd.f32 1.0, %v3329_v14  ;;  %v2804_v24 = vmul.f32 -0.5, %v3329_v14  ;;  %v2807_v28 = vand.u32 2147483647, %v3329_v14 }
 0x903   : > { %v3333_v15 = vpop.eup %3332  ;;  %v2831_v16 = vadd.f32 1.0, %v3331_v20  ;;  %v2834_v25 = vmul.f32 -0.5, %v3331_v20  ;;  %v2837_v17 = vand.u32 2147483647, %v3331_v20 }
 0x904   : > { %v3335_v19 = vpop.eup %3334  ;;  %3336 = vlog2.f32 %v2801_v21  ;;  %v2810_v22 = vadd.f32 1.0, %v3333_v15  ;;  %v2813_v10 = vmul.f32 -0.5, %v3333_v15  ;;  %v2805_v27 = vadd.f32 1.0, %v2804_v24 }
 0x905   : > { %3338 = vlog2.f32 %v2831_v16  ;;  %v2840_v23 = vadd.f32 1.0, %v3335_v19  ;;  %v2843_v12 = vmul.f32 -0.5, %v3335_v19  ;;  %v2835_v13 = vadd.f32 1.0, %v2834_v25 }
 0x906   : > { %3340 = vlog2.f32 %v2810_v22  ;;  %v2814_v29 = vadd.f32 1.0, %v2813_v10  ;;  %v2816_v37 = vand.u32 2147483647, %v3333_v15  ;;  %v2806_v41 = vmul.f32 %v3329_v14, %v2805_v27 }
 0x907   : > { %3342 = vlog2.f32 %v2840_v23  ;;  %v2844_v31 = vadd.f32 1.0, %v2843_v12  ;;  %vm2808_vm1 = vcmp.lt.f32.partialorder %v2807_v28, 0.0004427343  ;;  %v2836_v34 = vmul.f32 %v3331_v20, %v2835_v13 }
 0x908   : > { %v2846_v35 = vand.u32 2147483647, %v3335_v19  ;;  %vm2838_vm2 = vcmp.lt.f32.partialorder %v2837_v17, 0.0004427343  ;;  %v2815_v46 = vmul.f32 %v3333_v15, %v2814_v29  ;;  %vm2817_vm3 = vcmp.lt.f32.partialorder %v2816_v37, 0.0004427343 }
 0x909   : > { %v2845_v61 = vmul.f32 %v3335_v19, %v2844_v31 }
 0x90a   : > { %vm2847_vm4 = vcmp.lt.f32.partialorder %v2846_v35, 0.0004427343 }
 0x90e   : > { %v3337_v32 = vpop.eup %3336 }
 0x90f   : > { %v3339_v39 = vpop.eup %3338  ;;  %v2803_v40 = vmul.f32 0.6931472, %v3337_v32 }
 0x910   : > { %v3341_v42 = vpop.eup %3340  ;;  %v2833_v43 = vmul.f32 0.6931472, %v3339_v39 }
 0x911   : > { %v2809_v44 = vsel %vm2808_vm1, %v2806_v41, %v2803_v40  ;;  %v2812_v45 = vmul.f32 0.6931472, %v3341_v42  ;;  %v3343_v47 = vpop.eup %3342 }
 0x912   : > { %v2819_v50 = vadd.f32 %v2809_v44, %v2791_v33  ;;  %v2839_v52 = vsel %vm2838_vm2, %v2836_v34, %v2833_v43  ;;  %v2842_v57 = vmul.f32 0.6931472, %v3343_v47 }
 0x913   : > { %v2849_v55 = vadd.f32 %v2839_v52, %v2821_v36  ;;  %v2818_v56 = vsel %vm2817_vm3, %v2815_v46, %v2812_v45 }
 0x914   : > { %v2851_v18 = vsub.f32 0.0, %v2819_v50  ;;  %v2876_v0 = vsub.f32 %v3926_v62, %v2819_v50  ;;  %v2820_v49 = vadd.f32 %v2818_v56, %v2792_v30  ;;  %v2848_v59 = vsel %vm2847_vm4, %v2845_v61, %v2842_v57 }
 0x915   : > { %v2898_v58 = vsub.f32 0.0, %v2849_v55  ;;  %v2920_v2 = vsub.f32 %v3928_v63, %v2849_v55  ;;  %v2850_v5 = vadd.f32 %v2848_v59, %v2822_v54 }
 0x916   : > { %v2852_v3 = vsub.f32 0.0, %v2820_v49  ;;  %v2877_v4 = vsub.f32 %v3930_v1, %v2820_v49 }
 0x917   : > { %v2899_v8 = vsub.f32 0.0, %v2850_v5  ;;  %v2921_v9 = vsub.f32 %v3932_v48, %v2850_v5 }
 0x918   : > { %v2855_v6 = vcombine.low %v2851_v18, %v2852_v3  ;;  %v2880_v7 = vcombine.low %v2876_v0, %v2877_v4 }
 0x919   : > { %v2902_v20 = vcombine.low %v2898_v58, %v2899_v8  ;;  %v2924_v21 = vcombine.low %v2920_v2, %v2921_v9 }
 0x91a   : > { %v2862_v14 = vrot.slane %v2855_v6, %v2861_v60  ;;  %v2887_v62 = vrot.slane %v2880_v7, %v2861_v60 }
 0x91b   : > { %v2909_v1 = vrot.slane %v2902_v20, %v2861_v60  ;;  %v2931_v15 = vrot.slane %v2924_v21, %v2861_v60 }
 0x91c   : > { %v2869_v53 = vrot.slane %v2862_v14, %v2861_v60  ;;  %v2894_v63 = vrot.slane %v2887_v62, %v2861_v60 }
 0x91d   : > { %v2916_v16 = vrot.slane %v2909_v1, %v2861_v60  ;;  %v2938_v19 = vrot.slane %v2931_v15, %v2861_v60 }
 0x91e   : > { %2875 = vst.msk [vmem:[%s282_s20] ss:$2 sm:$0x3] %vm2873_vm5, %v2869_v53  ;;  %3159 = vst.msk [vmem:[%s282_s20 + $0x1] ss:$2 sm:$0x3] %vm2873_vm5, %v2894_v63 }
 0x91f   : > { %3160 = vst.msk [vmem:[%s282_s20 + $0x4] ss:$2 sm:$0x3] %vm2873_vm5, %v2916_v16  ;;  %3161 = vst.msk [vmem:[%s282_s20 + $0x5] ss:$2 sm:$0x3] %vm2873_vm5, %v2938_v19 }
 0x920 PF: > { %s19_s26 = sadd.s32 1, %s3350_s26  }
 0x921   : > { %p16_p4 = scmp.ge.s32.totalorder %s19_s26, 4  }
 0x923   :  { %18 = sbr.rel (!%p16_p4) target bundleno = 3 (0x3), region = 95 }

</bundles_post_ra>
